<compile_context>
chip_gen: v6e
topology: v6e:2x2x1
jax: 0.10.0
libtpu: 0.0.40
codegen_flags: <defaults>
</compile_context>

<pallas_src>
import functools

import numpy as np
import jax
import jax.numpy as jnp
from jax import lax
from jax.experimental import pallas as pl
from jax.experimental.pallas import tpu as pltpu


# ---------------------------------------------------------------------------
# Helpers
# ---------------------------------------------------------------------------

def _round_up(x, m):
    return ((x + m - 1) // m) * m


def _choose_tile_rows(R, kkc, co_pad, itemsize, budget_bytes):
    """Largest row tile (<= 1024) whose double-buffered blocks fit the VMEM budget."""
    def blocks_bytes(t):
        return (4 * 2 * t * kkc * itemsize      # 4 corner inputs, double-buffered
                + 2 * t * co_pad * 4            # f32 output block, double-buffered
                + t * kkc * 4)                  # f32 combine intermediate
    if R <= 1024 and blocks_bytes(R) <= budget_bytes:
        return R                                # single full-extent block (always legal)
    for t in (1024, 512, 256, 128, 64, 32, 16, 8):
        if t <= R and blocks_bytes(t) <= budget_bytes:
            return t
    return 8


# ---------------------------------------------------------------------------
# Pallas kernel: fused 4-corner bilinear combine + matmul + bias
# ---------------------------------------------------------------------------

def _deform_mm_kernel(v00_ref, v01_ref, v10_ref, v11_ref, w_ref, b_ref, o_ref):
    # Corner slabs are already (bilinear * modulator)-weighted; combine in f32 (VPU has
    # slack on this mem-bound kernel), feed the MXU in bf16 with f32 accumulation.
    dc = (v00_ref[...].astype(jnp.float32) + v01_ref[...].astype(jnp.float32)
          + v10_ref[...].astype(jnp.float32) + v11_ref[...].astype(jnp.float32))
    acc = jnp.dot(dc.astype(w_ref.dtype), w_ref[...],
                  preferred_element_type=jnp.float32)
    o_ref[...] = (acc + b_ref[...].astype(jnp.float32)).astype(o_ref.dtype)


def deform_matmul(v00, v01, v10, v11, w_t, b, *, out_dtype=jnp.float32):
    """out = (v00 + v01 + v10 + v11) @ w_t + b.

    v*: (R, KKC) weighted corner slabs; w_t: (KKC, Co); b: (Co,).  Returns (R, Co) f32.
    Only the output lane width is padded (to a multiple of 128); rows are not padded —
    the partial last grid block is masked by Pallas and rows are independent.
    """
    R, KKC = v00.shape
    Co = w_t.shape[1]
    Co_pad = _round_up(max(Co, 128), 128)
    if Co_pad != Co:
        w_t = jnp.pad(w_t, ((0, 0), (0, Co_pad - Co)))
        b = jnp.pad(b, (0, Co_pad - Co))
    b2 = b.astype(jnp.float32).reshape(1, Co_pad)

    itm = v00.dtype.itemsize
    tile = _choose_tile_rows(R, KKC, Co_pad, itm, budget_bytes=24 << 20)
    grid = (pl.cdiv(R, tile),)

    # VMEM budget: 4 double-buffered inputs + double-buffered f32 output + f32 intermediate,
    # plus TWO copies of the resident weight block (default pipelining) and the bias.
    per_tile = 4 * 2 * tile * KKC * itm + 2 * tile * Co_pad * 4 + tile * KKC * 4
    fixed = 2 * KKC * Co_pad * w_t.dtype.itemsize + 2 * Co_pad * 4
    vmem_limit = int(min(max(fixed + per_tile + (8 << 20), 32 << 20), 40 << 20))

    cost = pl.CostEstimate(
        flops=2 * R * KKC * Co_pad + 4 * R * KKC,
        transcendentals=0,
        bytes_accessed=4 * R * KKC * itm + KKC * Co_pad * w_t.dtype.itemsize
        + R * Co_pad * 4)

    row_spec = pl.BlockSpec((tile, KKC), lambda i: (i, 0))
    out = pl.pallas_call(
        _deform_mm_kernel,
        out_shape=jax.ShapeDtypeStruct((R, Co_pad), out_dtype),
        grid=grid,
        in_specs=[row_spec, row_spec, row_spec, row_spec,
                  pl.BlockSpec((KKC, Co_pad), lambda i: (0, 0)),
                  pl.BlockSpec((1, Co_pad), lambda i: (0, 0))],
        out_specs=pl.BlockSpec((tile, Co_pad), lambda i: (i, 0)),
        compiler_params=pltpu.CompilerParams(
            dimension_semantics=("parallel",),
            vmem_limit_bytes=vmem_limit),
        cost_estimate=cost,
    )(v00, v01, v10, v11, w_t, b2)
    return out[:, :Co]


# ---------------------------------------------------------------------------
# XLA glue: weighted 4-corner gather (torchvision bilinear semantics)
# ---------------------------------------------------------------------------

def _weighted_corner_slabs(x_nhwc, offset, modulator, K, stride, padding):
    """Four corner slabs of the deformed, modulated im2col, each already multiplied by its
    (bilinear weight * validity * modulator) factor.

    x_nhwc: (N, H, W, C) bf16; offset: (N, Ho, Wo, K*K, 2) with [...,0]=dy, [...,1]=dx
    (torchvision interleaved order); modulator: (N, Ho, Wo, K*K).
    Returns 4 arrays of shape (N*Ho*Wo, K*K*C) in (kh, kw, c) column order, dtype of x.

    TODO(synk): the data-dependent corner gather stays in XLA (row gather of contiguous
    length-C vectors); a manual-DMA in-kernel gather (paged-attention-style) would remove
    the 36x|x| slab round trip but is not warranted at these sizes.
    """
    N, H, W, C = x_nhwc.shape
    Ho, Wo, KK = offset.shape[1], offset.shape[2], offset.shape[3]
    P = Ho * Wo * KK
    f32 = jnp.float32

    ky = jnp.repeat(jnp.arange(K, dtype=f32), K)      # kernel row for k = kh*K + kw
    kx = jnp.tile(jnp.arange(K, dtype=f32), K)        # kernel col
    base_y = (jnp.arange(Ho, dtype=f32) * stride - padding)[:, None, None] + ky[None, None, :]
    base_x = (jnp.arange(Wo, dtype=f32) * stride - padding)[None, :, None] + kx[None, None, :]
    py = base_y[None, :, :, :] + offset[..., 0]       # (N, Ho, Wo, KK)
    px = base_x[None, :, :, :] + offset[..., 1]

    y0 = jnp.floor(py)
    x0 = jnp.floor(px)
    y1 = y0 + 1.0
    x1 = x0 + 1.0
    wy1 = py - y0
    wy0 = 1.0 - wy1
    wx1 = px - x0
    wx0 = 1.0 - wx1

    m = modulator.reshape(N, P).astype(f32)
    x_rows = x_nhwc.reshape(N, H * W, C)              # channels-last rows (lane-contiguous)

    def corner(yi, xi, wgt):
        # Each out-of-range corner contributes zero (matches torchvision's kernel).
        valid = (yi >= 0) & (yi <= H - 1) & (xi >= 0) & (xi <= W - 1)
        yc = jnp.clip(yi, 0, H - 1).astype(jnp.int32)
        xc = jnp.clip(xi, 0, W - 1).astype(jnp.int32)
        idx = (yc * W + xc).reshape(N, P)
        w = (wgt * valid.astype(f32)).reshape(N, P) * m
        g = jax.vmap(lambda xb, ib: jnp.take(xb, ib, axis=0))(x_rows, idx)   # (N, P, C)
        # Weighting fused into the gather epilogue; written once in bf16.
        slab = (g.astype(f32) * w[..., None]).astype(x_nhwc.dtype)
        return slab.reshape(N * Ho * Wo, KK * C)

    return (corner(y0, x0, wy0 * wx0), corner(y0, x1, wy0 * wx1),
            corner(y1, x0, wy1 * wx0), corner(y1, x1, wy1 * wx1))


# ---------------------------------------------------------------------------
# DeformableConv2d forward
# ---------------------------------------------------------------------------

def prepare_params(params, kernel_size, compute_dtype=jnp.bfloat16):
    """One-time weight re-layout (hoisted out of the per-call path)."""
    K = kernel_size
    KK = K * K
    C_out, C_in = params["w_reg"].shape[:2]
    w_offmod_hwio = jnp.concatenate(
        [jnp.transpose(params["w_off"], (2, 3, 1, 0)),     # (K, K, C_in, 2*KK)
         jnp.transpose(params["w_mod"], (2, 3, 1, 0))],    # (K, K, C_in, KK)
        axis=-1).astype(compute_dtype)
    b_offmod = jnp.concatenate([params["b_off"], params["b_mod"]]).astype(jnp.float32)
    w_reg_t = jnp.transpose(params["w_reg"], (0, 2, 3, 1)).reshape(C_out, KK * C_in).T
    b_reg = params.get("b_reg")
    b_reg = jnp.zeros((C_out,), jnp.float32) if b_reg is None else b_reg.astype(jnp.float32)
    return {"w_offmod_hwio": w_offmod_hwio, "b_offmod": b_offmod,
            "w_reg_t": w_reg_t.astype(compute_dtype), "b_reg": b_reg}


def deformable_conv2d(x, prep, *, kernel_size=3, stride=1, padding=1,
                      compute_dtype=jnp.bfloat16):
    """x: (N, C_in, H, W) NCHW -> (N, C_out, Ho, Wo) f32.  Matches groups=1 torchvision
    deform_conv2d with mask (modulated / DCNv2), as used by the PyTorch module."""
    K = kernel_size
    KK = K * K
    N, C_in, H, W = x.shape
    C_out = prep["w_reg_t"].shape[1]

    # Single entry transpose; cast to bf16 once so every big intermediate is bf16.
    x_nhwc = jnp.transpose(x, (0, 2, 3, 1)).astype(compute_dtype)

    # Offset + modulator conv: XLA conv (no im2col slab), f32 accumulate, tiny output.
    offmod = lax.conv_general_dilated(
        x_nhwc, prep["w_offmod_hwio"], (stride, stride),
        ((padding, padding), (padding, padding)),
        dimension_numbers=("NHWC", "HWIO", "NHWC"),
        preferred_element_type=jnp.float32)
    offmod = offmod + prep["b_offmod"]
    Ho, Wo = offmod.shape[1], offmod.shape[2]
    offset = offmod[..., :2 * KK].reshape(N, Ho, Wo, KK, 2)    # [...,0]=dy, [...,1]=dx
    modulator = 2.0 * jax.nn.sigmoid(offmod[..., 2 * KK:])     # (N, Ho, Wo, KK)

    # Weighted 4-corner gather (bf16), then one fused Pallas combine+matmul+bias.
    v00, v01, v10, v11 = _weighted_corner_slabs(x_nhwc, offset, modulator, K, stride, padding)
    out_flat = deform_matmul(v00, v01, v10, v11, prep["w_reg_t"], prep["b_reg"])

    # Keep the module's NCHW f32 output contract (consumer could take NHWC/bf16 if tolerated).
    return out_flat.reshape(N, Ho, Wo, C_out).transpose(0, 3, 1, 2)


def init_params(key, in_channels, out_channels, kernel_size=3, dtype=jnp.float32):
    """Matches DeformableConv2d.__init__: offset/modulator convs zero-initialized;
    regular_conv weight deterministically random; bias=False (default)."""
    K = kernel_size
    w_reg = 0.1 * jax.random.normal(key, (out_channels, in_channels, K, K), dtype)
    return {
        "w_off": jnp.zeros((2 * K * K, in_channels, K, K), dtype),
        "b_off": jnp.zeros((2 * K * K,), dtype),
        "w_mod": jnp.zeros((K * K, in_channels, K, K), dtype),
        "b_mod": jnp.zeros((K * K,), dtype),
        "w_reg": w_reg,
    }


# ---------------------------------------------------------------------------
# Pure-JAX f32 reference (torchvision.ops.deform_conv2d semantics) for the self-test
# ---------------------------------------------------------------------------

def deform_conv2d_ref(x, params, K, stride, padding):
    N, C, H, W = x.shape
    dn = ("NCHW", "OIHW", "NCHW")
    pad2 = ((padding, padding), (padding, padding))
    off = lax.conv_general_dilated(x, params["w_off"], (stride, stride), pad2,
                                   dimension_numbers=dn) + params["b_off"][None, :, None, None]
    mod = lax.conv_general_dilated(x, params["w_mod"], (stride, stride), pad2,
                                   dimension_numbers=dn) + params["b_mod"][None, :, None, None]
    mod = 2.0 * jax.nn.sigmoid(mod)
    w_reg = params["w_reg"]
    Co, Ho, Wo = w_reg.shape[0], off.shape[2], off.shape[3]
    hs = (jnp.arange(Ho) * stride - padding).astype(jnp.float32)
    ws = (jnp.arange(Wo) * stride - padding).astype(jnp.float32)

    def sample(py, px):
        y0 = jnp.floor(py)
        x0 = jnp.floor(px)
        acc = jnp.zeros((N, C, Ho, Wo), jnp.float32)
        for dy_i, dx_i in ((0, 0), (0, 1), (1, 0), (1, 1)):
            yi = y0 + dy_i
            xi = x0 + dx_i
            wgt = (1.0 - jnp.abs(py - yi)) * (1.0 - jnp.abs(px - xi))
            valid = (yi >= 0) & (yi <= H - 1) & (xi >= 0) & (xi <= W - 1)
            yc = jnp.clip(yi, 0, H - 1).astype(jnp.int32)
            xc = jnp.clip(xi, 0, W - 1).astype(jnp.int32)
            v = jax.vmap(lambda xb, yb, xb2: xb[:, yb, xb2])(x, yc, xc)   # (N, C, Ho, Wo)
            acc = acc + v * (wgt * valid)[:, None]
        return acc

    out = jnp.zeros((N, Co, Ho, Wo), jnp.float32)
    for kh in range(K):
        for kw_ in range(K):
            k = kh * K + kw_
            py = hs[None, :, None] + kh + off[:, 2 * k]
            px = ws[None, None, :] + kw_ + off[:, 2 * k + 1]
            v = sample(py, px) * mod[:, k][:, None]
            out = out + jnp.einsum("oc,nchw->nohw", w_reg[:, :, kh, kw_], v)
    b_reg = params.get("b_reg")
    if b_reg is not None:
        out = out + b_reg[None, :, None, None]
    return out


# ---------------------------------------------------------------------------
# Self-test
# ---------------------------------------------------------------------------

if __name__ == "__main__":
    key = jax.random.PRNGKey(0)
    kx, kw, ko, kob, km, kmb = jax.random.split(key, 6)

    N, C_in, H, W = 2, 4, 16, 16
    C_out, K, stride, padding = 8, 3, 1, 1

    x = jax.random.normal(kx, (N, C_in, H, W), jnp.float32)

    fwd = jax.jit(functools.partial(deformable_conv2d, kernel_size=K,
                                    stride=stride, padding=padding))

    # --- Test 1: module's actual init (zero offset/modulator convs) vs plain conv. ---
    params0 = init_params(kw, C_in, C_out, K)
    prep0 = prepare_params(params0, K)
    out0 = jax.block_until_ready(fwd(x, prep0))
    ref0 = lax.conv_general_dilated(
        x, params0["w_reg"], (stride, stride),
        ((padding, padding), (padding, padding)),
        dimension_numbers=("NCHW", "OIHW", "NCHW"))
    np.testing.assert_allclose(np.asarray(out0), np.asarray(ref0), rtol=2e-2, atol=2e-2)

    # --- Test 2: nonzero offsets/modulator vs a pure-JAX f32 reference. ---
    params1 = dict(params0)
    params1["w_off"] = 0.05 * jax.random.normal(ko, params0["w_off"].shape, jnp.float32)
    params1["b_off"] = 0.05 * jax.random.normal(kob, params0["b_off"].shape, jnp.float32)
    params1["w_mod"] = 0.1 * jax.random.normal(km, params0["w_mod"].shape, jnp.float32)
    params1["b_mod"] = 0.1 * jax.random.normal(kmb, params0["b_mod"].shape, jnp.float32)
    prep1 = prepare_params(params1, K)
    out1 = jax.block_until_ready(fwd(x, prep1))
    ref1 = deform_conv2d_ref(x, params1, K, stride, padding)
    np.testing.assert_allclose(np.asarray(out1), np.asarray(ref1), rtol=4e-2, atol=4e-2)

    print("KERNEL_OK")
</pallas_src>

<mosaic_0001>
module attributes {stable_mosaic.version = 11 : i64} {
  func.func @_deform_mm_kernel(%arg0: i32, %arg1: memref<512x36xbf16, #tpu.memory_space<vmem>>, %arg2: memref<512x36xbf16, #tpu.memory_space<vmem>>, %arg3: memref<512x36xbf16, #tpu.memory_space<vmem>>, %arg4: memref<512x36xbf16, #tpu.memory_space<vmem>>, %arg5: memref<36x128xbf16, #tpu.memory_space<vmem>>, %arg6: memref<1x128xf32, #tpu.memory_space<vmem>>, %arg7: memref<512x128xf32, #tpu.memory_space<vmem>>) attributes {dimension_semantics = [#tpu.dimension_semantics<parallel>], iteration_bounds = array<i64: 1>, scalar_prefetch = 0 : i64, scratch_operands = 0 : i64, tpu.core_type = #tpu.core_type<tc>, window_params = [{transform_indices = @transform_0, window_bounds = array<i64: 512, 36>}, {transform_indices = @transform_1, window_bounds = array<i64: 512, 36>}, {transform_indices = @transform_2, window_bounds = array<i64: 512, 36>}, {transform_indices = @transform_3, window_bounds = array<i64: 512, 36>}, {pipeline_mode = #tpu.pipeline_mode<synchronous>, transform_indices = @transform_4, window_bounds = array<i64: 36, 128>}, {pipeline_mode = #tpu.pipeline_mode<synchronous>, transform_indices = @transform_5, window_bounds = array<i64: 1, 128>}, {transform_indices = @transform_6, window_bounds = array<i64: 512, 128>}]} {
    %c0 = arith.constant 0 : index
    %c0_0 = arith.constant 0 : index
    %0 = vector.load %arg1[%c0, %c0_0] : memref<512x36xbf16, #tpu.memory_space<vmem>>, vector<512x36xbf16>
    %1 = arith.extf %0 : vector<512x36xbf16> to vector<512x36xf32>
    %c0_1 = arith.constant 0 : index
    %c0_2 = arith.constant 0 : index
    %2 = vector.load %arg2[%c0_1, %c0_2] : memref<512x36xbf16, #tpu.memory_space<vmem>>, vector<512x36xbf16>
    %3 = arith.extf %2 : vector<512x36xbf16> to vector<512x36xf32>
    %4 = arith.addf %1, %3 : vector<512x36xf32>
    %c0_3 = arith.constant 0 : index
    %c0_4 = arith.constant 0 : index
    %5 = vector.load %arg3[%c0_3, %c0_4] : memref<512x36xbf16, #tpu.memory_space<vmem>>, vector<512x36xbf16>
    %6 = arith.extf %5 : vector<512x36xbf16> to vector<512x36xf32>
    %7 = arith.addf %4, %6 : vector<512x36xf32>
    %c0_5 = arith.constant 0 : index
    %c0_6 = arith.constant 0 : index
    %8 = vector.load %arg4[%c0_5, %c0_6] : memref<512x36xbf16, #tpu.memory_space<vmem>>, vector<512x36xbf16>
    %9 = arith.extf %8 : vector<512x36xbf16> to vector<512x36xf32>
    %10 = arith.addf %7, %9 : vector<512x36xf32>
    %11 = arith.truncf %10 : vector<512x36xf32> to vector<512x36xbf16>
    %c0_7 = arith.constant 0 : index
    %c0_8 = arith.constant 0 : index
    %12 = vector.load %arg5[%c0_7, %c0_8] : memref<36x128xbf16, #tpu.memory_space<vmem>>, vector<36x128xbf16>
    %cst = arith.constant dense<0.000000e+00> : vector<512x128xf32>
    %13 = tpu.matmul %11, %12, %cst {dimension_numbers = #tpu.dot_dimension_numbers<[1], [0], [0], [1], [0, 0, 1, 1], [], []>} : vector<512x36xbf16>, vector<36x128xbf16>, vector<512x128xf32> -> vector<512x128xf32>
    %c0_9 = arith.constant 0 : index
    %c0_10 = arith.constant 0 : index
    %14 = vector.load %arg6[%c0_9, %c0_10] : memref<1x128xf32, #tpu.memory_space<vmem>>, vector<1x128xf32>
    %15 = vector.broadcast %14 : vector<1x128xf32> to vector<512x128xf32>
    %16 = arith.addf %13, %15 : vector<512x128xf32>
    %c0_11 = arith.constant 0 : index
    %c0_12 = arith.constant 0 : index
    %17 = vector.load %arg7[%c0_11, %c0_12] : memref<512x128xf32, #tpu.memory_space<vmem>>, vector<512x128xf32>
    tpu.vector_store %arg7[%c0_11, %c0_12], %16 {strides = array<i32>} : memref<512x128xf32, #tpu.memory_space<vmem>>, vector<512x128xf32>,
    return
  }
  func.func @transform_0(%arg0: i32) -> (i32, i32) {
    %c0_i32 = arith.constant 0 : i32
    %c0_i32_0 = arith.constant 0 : i32
    return %arg0, %c0_i32 : i32, i32
  }
  func.func @transform_1(%arg0: i32) -> (i32, i32) {
    %c0_i32 = arith.constant 0 : i32
    %c0_i32_0 = arith.constant 0 : i32
    return %arg0, %c0_i32 : i32, i32
  }
  func.func @transform_2(%arg0: i32) -> (i32, i32) {
    %c0_i32 = arith.constant 0 : i32
    %c0_i32_0 = arith.constant 0 : i32
    return %arg0, %c0_i32 : i32, i32
  }
  func.func @transform_3(%arg0: i32) -> (i32, i32) {
    %c0_i32 = arith.constant 0 : i32
    %c0_i32_0 = arith.constant 0 : i32
    return %arg0, %c0_i32 : i32, i32
  }
  func.func @transform_4(%arg0: i32) -> (i32, i32) {
    %c0_i32 = arith.constant 0 : i32
    %c0_i32_0 = arith.constant 0 : i32
    %c0_i32_1 = arith.constant 0 : i32
    return %c0_i32, %c0_i32_0 : i32, i32
  }
  func.func @transform_5(%arg0: i32) -> (i32, i32) {
    %c0_i32 = arith.constant 0 : i32
    %c0_i32_0 = arith.constant 0 : i32
    %c0_i32_1 = arith.constant 0 : i32
    return %c0_i32, %c0_i32_0 : i32, i32
  }
  func.func @transform_6(%arg0: i32) -> (i32, i32) {
    %c0_i32 = arith.constant 0 : i32
    %c0_i32_0 = arith.constant 0 : i32
    return %arg0, %c0_i32 : i32, i32
  }
}

</mosaic_0001>

<bundles_post_ra>
// kernel: deformable_conv2d.1
= control target key start
LH: loop header
LB: loop body
LE: loop exit
PB: predicated region body
PF: predicated region fallthrough
CT: control target
= control target key end

     0   :  { %vm884_vm0 = vcmask 1041408   ;;  %vm787_vm1 = vcmask 293888   ;;  %s2754_s4 = inlined_call_operand.vmem [shape: bf16[36,128], index: 4, kind: input, shape index: {}]   ;;  %s2755_s0 = inlined_call_operand.vmem [shape: bf16[512,36], index: 0, kind: input, shape index: {}]   ;;  %s2756_s1 = inlined_call_operand.vmem [shape: bf16[512,36], index: 1, kind: input, shape index: {}]   ;;  %s2757_s2 = inlined_call_operand.vmem [shape: bf16[512,36], index: 2, kind: input, shape index: {}]   ;;  %s2758_s3 = inlined_call_operand.vmem [shape: bf16[512,36], index: 3, kind: input, shape index: {}]   ;;  %s2759_s5 = inlined_call_operand.vmem [shape: f32[1,128], index: 5, kind: input, shape index: {}]   ;;  %s2760_s6 = inlined_call_operand.vmem [shape: f32[512,128], index: 6, kind: output, shape index: {}]  }
   0x1   :  { %v2030_v0 = vld [vmem:[%s2754_s4 + $0x10] ss:$0 sps:$4 sm:$0x33]   ;;  %v2031_v1 = vld [vmem:[%s2754_s4 + $0x8] sm:$0xff]   ;;  %v2032_v3 = vld [vmem:[%s2754_s4] sm:$0xff]  }
   0x2   :  { %2028 = vmatprep.subr.msk.bf16.mxu0 %vm884_vm0, %v2030_v0  ;;  %2029 = vmatprep.subr.msk.bf16.mxu1 %vm884_vm0, %v2030_v0  ;;  %v886_v2 = vsel %vm884_vm0, %v2030_v0, 0  ;;  %v1282_v4 = vld [vmem:[%s2755_s0] sm:$0xff]   ;;  %v1793_v22 = vld [vmem:[%s2755_s0 + $0x8] sm:$0xff]  }
   0x3   :  { %1953 = vmatpush3.bf16.msra.mxu0 %v886_v2  ;;  %2025 = vmatpush3.bf16.msra.mxu1 %v886_v2  ;;  %v1283_v5 = vunpack.c.l.bf16 %v1282_v4  ;;  %v1284_v6 = vunpack.c.h.bf16 %v1282_v4  ;;  %v1410_v7 = vld [vmem:[%s2756_s1] sm:$0xff]   ;;  %v1824_v27 = vld [vmem:[%s2756_s1 + $0x8] sm:$0xff]   ;;  %v1287_v36 = vunpack.c.l.bf16 %v1793_v22  ;;  %v1288_v38 = vunpack.c.h.bf16 %v1793_v22  ;;  %v1794_v2 = vld [vmem:[%s2755_s0 + $0x10] sm:$0xff]  }
   0x4   :  { %v1538_v8 = vld [vmem:[%s2757_s2] sm:$0xff]   ;;  %1954 = vmatprep.subr.bf16.mxu0 %v2031_v1  ;;  %2023 = vmatprep.subr.bf16.mxu1 %v2031_v1  ;;  %v1411_v10 = vunpack.c.l.bf16 %v1410_v7  ;;  %v1412_v11 = vunpack.c.h.bf16 %v1410_v7  ;;  %v1855_v32 = vld [vmem:[%s2757_s2 + $0x8] sm:$0xff]   ;;  %v1415_v39 = vunpack.c.l.bf16 %v1824_v27  ;;  %v1416_v40 = vunpack.c.h.bf16 %v1824_v27 }
   0x5   :  { %v1666_v9 = vld [vmem:[%s2758_s3] sm:$0xff]   ;;  %v1539_v12 = vunpack.c.l.bf16 %v1538_v8  ;;  %v1540_v13 = vunpack.c.h.bf16 %v1538_v8  ;;  %v1886_v41 = vld [vmem:[%s2758_s3 + $0x8] sm:$0xff]   ;;  %v1543_v45 = vunpack.c.l.bf16 %v1855_v32  ;;  %v1544_v50 = vunpack.c.h.bf16 %v1855_v32  ;;  %v1856_v8 = vld [vmem:[%s2757_s2 + $0x10] sm:$0xff]  }
   0x6   :  { %v1808_v14 = vld [vmem:[%s2755_s0 + $0x80] sm:$0xff]   ;;  %v1667_v17 = vunpack.c.l.bf16 %v1666_v9  ;;  %v1668_v18 = vunpack.c.h.bf16 %v1666_v9  ;;  %v280_v23 = vadd.f32 %v1411_v10, %v1283_v5  ;;  %v281_v24 = vadd.f32 %v1412_v11, %v1284_v6  ;;  %v1809_v46 = vld [vmem:[%s2755_s0 + $0x88] sm:$0xff]  }
   0x7   :  { %v1839_v15 = vld [vmem:[%s2756_s1 + $0x80] sm:$0xff]   ;;  %v1347_v19 = vunpack.c.l.bf16 %v1808_v14  ;;  %v1348_v20 = vunpack.c.h.bf16 %v1808_v14  ;;  %1955 = vmatpush3.bf16.msra.mxu0 %v2031_v1  ;;  %2026 = vmatpush3.bf16.msra.mxu1 %v2031_v1  ;;  %v282_v48 = vadd.f32 %v1415_v39, %v1287_v36  ;;  %v283_v49 = vadd.f32 %v1416_v40, %v1288_v38  ;;  %v1840_v51 = vld [vmem:[%s2756_s1 + $0x88] sm:$0xff]   ;;  %v1795_v38 = vld [vmem:[%s2755_s0 + $0x18] sm:$0xff]  }
   0x8   :  { %v1870_v16 = vld [vmem:[%s2757_s2 + $0x80] sm:$0xff]   ;;  %v1475_v25 = vunpack.c.l.bf16 %v1839_v15  ;;  %v1476_v26 = vunpack.c.h.bf16 %v1839_v15  ;;  %1956 = vmatprep.subr.bf16.mxu0 %v2032_v3  ;;  %2024 = vmatprep.subr.bf16.mxu1 %v2032_v3  ;;  %v472_v33 = vadd.f32 %v1539_v12, %v280_v23  ;;  %v473_v34 = vadd.f32 %v1540_v13, %v281_v24  ;;  %v1871_v52 = vld [vmem:[%s2757_s2 + $0x88] sm:$0xff]   ;;  %v1887_v13 = vld [vmem:[%s2758_s3 + $0x10] sm:$0xff]  }
   0x9   :  { %v1901_v21 = vld [vmem:[%s2758_s3 + $0x80] sm:$0xff]   ;;  %v1603_v28 = vunpack.c.l.bf16 %v1870_v16  ;;  %v1604_v29 = vunpack.c.h.bf16 %v1870_v16  ;;  %v1671_v55 = vunpack.c.l.bf16 %v1886_v41  ;;  %v1672_v56 = vunpack.c.h.bf16 %v1886_v41  ;;  %v1902_v61 = vld [vmem:[%s2758_s3 + $0x88] sm:$0xff]   ;;  %v1841_v23 = vld [vmem:[%s2756_s1 + $0x90] sm:$0xff]  }
   0xa   :  { %v1731_v30 = vunpack.c.l.bf16 %v1901_v21  ;;  %v1732_v31 = vunpack.c.h.bf16 %v1901_v21  ;;  %v312_v35 = vadd.f32 %v1475_v25, %v1347_v19  ;;  %v313_v37 = vadd.f32 %v1476_v26, %v1348_v20 }
   0xb   :  { %v664_v42 = vadd.f32 %v1667_v17, %v472_v33  ;;  %v665_v43 = vadd.f32 %v1668_v18, %v473_v34  ;;  %1957 = vmatpush3.bf16.msra.mxu0 %v2032_v3  ;;  %2027 = vmatpush3.bf16.msra.mxu1 %v2032_v3  ;;  %v474_v58 = vadd.f32 %v1543_v45, %v282_v48  ;;  %v1351_v60 = vunpack.c.l.bf16 %v1809_v46  ;;  %v1825_v3 = vld [vmem:[%s2756_s1 + $0x10] sm:$0xff]   ;;  %v1857_v48 = vld [vmem:[%s2757_s2 + $0x18] sm:$0xff]  }
   0xc   :  { %v504_v44 = vadd.f32 %v1603_v28, %v312_v35  ;;  %v505_v47 = vadd.f32 %v1604_v29, %v313_v37  ;;  %v475_v59 = vadd.f32 %v1544_v50, %v283_v49  ;;  %v1352_v62 = vunpack.c.h.bf16 %v1809_v46  ;;  %v1810_v18 = vld [vmem:[%s2755_s0 + $0x90] sm:$0xff]   ;;  %v1888_v49 = vld [vmem:[%s2758_s3 + $0x18] sm:$0xff]  }
   0xd   :  { %v728_v53 = vpack.c.bf16 %v665_v43, %v664_v42  ;;  %v1479_v63 = vunpack.c.l.bf16 %v1840_v51  ;;  %v1480_v0 = vunpack.c.h.bf16 %v1840_v51  ;;  %v1607_v1 = vunpack.c.l.bf16 %v1871_v52  ;;  %v1872_v28 = vld [vmem:[%s2757_s2 + $0x90] sm:$0xff]   ;;  %v1826_v43 = vld [vmem:[%s2756_s1 + $0x18] sm:$0xff]  }
   0xe   :  { %v696_v54 = vadd.f32 %v1731_v30, %v504_v44  ;;  %v697_v57 = vadd.f32 %v1732_v31, %v505_v47  ;;  %v666_v5 = vadd.f32 %v1671_v55, %v474_v58  ;;  %v667_v6 = vadd.f32 %v1672_v56, %v475_v59  ;;  %v1903_v33 = vld [vmem:[%s2758_s3 + $0x90] sm:$0xff]   ;;  %v1811_v58 = vld [vmem:[%s2755_s0 + $0x98] sm:$0xff]  }
   0xf   :  { %1958 = vmatprep.mubr.msk.bf16.mxu0 %vm787_vm1, %v728_v53  ;;  %v1608_v7 = vunpack.c.h.bf16 %v1871_v52  ;;  %v314_v9 = vadd.f32 %v1479_v63, %v1351_v60  ;;  %v315_v10 = vadd.f32 %v1480_v0, %v1352_v62  ;;  %v1735_v11 = vunpack.c.l.bf16 %v1902_v61  ;;  %v1842_v59 = vld [vmem:[%s2756_s1 + $0x98] sm:$0xff]  }
  0x10   :  { %v744_v4 = vpack.c.bf16 %v697_v57, %v696_v54  ;;  %v1736_v12 = vunpack.c.h.bf16 %v1902_v61  ;;  %v729_v14 = vpack.c.bf16 %v667_v6, %v666_v5  ;;  %v1291_v15 = vunpack.c.l.bf16 %v1794_v2  ;;  %v1904_v5 = vld [vmem:[%s2758_s3 + $0x98] sm:$0xff]  }
  0x11   :  { %v1292_v16 = vunpack.c.h.bf16 %v1794_v2  ;;  %v1419_v17 = vunpack.c.l.bf16 %v1825_v3  ;;  %v506_v19 = vadd.f32 %v1607_v1, %v314_v9  ;;  %v507_v20 = vadd.f32 %v1608_v7, %v315_v10 }
  0x12   :  { %1990 = vmatprep.mubr.msk.bf16.mxu1 %vm787_vm1, %v744_v4  ;;  %v1420_v21 = vunpack.c.h.bf16 %v1825_v3  ;;  %v1547_v22 = vunpack.c.l.bf16 %v1856_v8  ;;  %1959 = vmatmul.mubr.msk.bf16.vlgmr.msra.gmra.mxu0 %vm787_vm1, %v729_v14  ;;  %v1548_v25 = vunpack.c.h.bf16 %v1856_v8  ;;  %v1675_v26 = vunpack.c.l.bf16 %v1887_v13  ;;  %v1873_v4 = vld [vmem:[%s2757_s2 + $0x98] sm:$0xff]   ;;  %v1796_v14 = vld [vmem:[%s2755_s0 + $0x20] sm:$0xff]  }
  0x13   :  { %v284_v24 = vadd.f32 %v1419_v17, %v1291_v15  ;;  %v1676_v27 = vunpack.c.h.bf16 %v1887_v13  ;;  %v698_v29 = vadd.f32 %v1735_v11, %v506_v19  ;;  %v699_v30 = vadd.f32 %v1736_v12, %v507_v20  ;;  %v1827_v15 = vld [vmem:[%s2756_s1 + $0x20] sm:$0xff]  }
  0x14   :  { %v285_v31 = vadd.f32 %v1420_v21, %v1292_v16  ;;  %v1355_v32 = vunpack.c.l.bf16 %v1810_v18  ;;  %v1356_v35 = vunpack.c.h.bf16 %v1810_v18  ;;  %v1483_v36 = vunpack.c.l.bf16 %v1841_v23  ;;  %v1858_v20 = vld [vmem:[%s2757_s2 + $0x20] sm:$0xff]  }
  0x15   :  { %v476_v34 = vadd.f32 %v1547_v22, %v284_v24  ;;  %v1484_v37 = vunpack.c.h.bf16 %v1841_v23  ;;  %v745_v39 = vpack.c.bf16 %v699_v30, %v698_v29  ;;  %v1611_v41 = vunpack.c.l.bf16 %v1872_v28  ;;  %v1812_v30 = vld [vmem:[%s2755_s0 + $0xa0] sm:$0xff]  }
  0x16   :  { %v477_v40 = vadd.f32 %v1548_v25, %v285_v31  ;;  %v1612_v42 = vunpack.c.h.bf16 %v1872_v28  ;;  %v316_v45 = vadd.f32 %v1483_v36, %v1355_v32  ;;  %v1739_v47 = vunpack.c.l.bf16 %v1903_v33  ;;  %v1889_v25 = vld [vmem:[%s2758_s3 + $0x20] sm:$0xff]  }
  0x17   :  { %v668_v44 = vadd.f32 %v1675_v26, %v476_v34  ;;  %v317_v46 = vadd.f32 %v1484_v37, %v1356_v35  ;;  %1991 = vmatmul.mubr.msk.bf16.vlgmr.msra.gmra.mxu1 %vm787_vm1, %v745_v39  ;;  %v1740_v51 = vunpack.c.h.bf16 %v1903_v33  ;;  %v1295_v52 = vunpack.c.l.bf16 %v1795_v38  ;;  %v1843_v35 = vld [vmem:[%s2756_s1 + $0xa0] sm:$0xff]  }
  0x18   :  { %v669_v50 = vadd.f32 %v1676_v27, %v477_v40  ;;  %v1296_v53 = vunpack.c.h.bf16 %v1795_v38  ;;  %v508_v54 = vadd.f32 %v1611_v41, %v316_v45  ;;  %v1423_v56 = vunpack.c.l.bf16 %v1826_v43  ;;  %v1874_v40 = vld [vmem:[%s2757_s2 + $0xa0] sm:$0xff]  }
  0x19   :  { %v509_v55 = vadd.f32 %v1612_v42, %v317_v46  ;;  %v1424_v57 = vunpack.c.h.bf16 %v1826_v43  ;;  %v1551_v61 = vunpack.c.l.bf16 %v1857_v48  ;;  %v1552_v62 = vunpack.c.h.bf16 %v1857_v48  ;;  %v1905_v45 = vld [vmem:[%s2758_s3 + $0xa0] sm:$0xff]  }
  0x1a   :  { %v730_v60 = vpack.c.bf16 %v669_v50, %v668_v44  ;;  %v1679_v63 = vunpack.c.l.bf16 %v1888_v49  ;;  %v700_v0 = vadd.f32 %v1739_v47, %v508_v54  ;;  %v286_v2 = vadd.f32 %v1423_v56, %v1295_v52  ;;  %v1797_v50 = vld [vmem:[%s2755_s0 + $0x28] sm:$0xff]  }
  0x1b   :  { %v701_v1 = vadd.f32 %v1740_v51, %v509_v55  ;;  %v287_v3 = vadd.f32 %v1424_v57, %v1296_v53  ;;  %v1680_v6 = vunpack.c.h.bf16 %v1888_v49  ;;  %v1359_v7 = vunpack.c.l.bf16 %v1811_v58  ;;  %v1828_v55 = vld [vmem:[%s2756_s1 + $0x28] sm:$0xff]  }
  0x1c   :  { %1962 = vmatprep.mubr.msk.bf16.mxu0 %vm787_vm1, %v730_v60  ;;  %v1360_v8 = vunpack.c.h.bf16 %v1811_v58  ;;  %v1487_v9 = vunpack.c.l.bf16 %v1842_v59  ;;  %v478_v11 = vadd.f32 %v1551_v61, %v286_v2  ;;  %v1488_v13 = vunpack.c.h.bf16 %v1842_v59  ;;  %v1859_v60 = vld [vmem:[%s2757_s2 + $0x28] sm:$0xff]  }
  0x1d   :  { %v746_v10 = vpack.c.bf16 %v701_v1, %v700_v0  ;;  %v479_v12 = vadd.f32 %v1552_v62, %v287_v3  ;;  %v1615_v17 = vunpack.c.l.bf16 %v1873_v4  ;;  %v1616_v18 = vunpack.c.h.bf16 %v1873_v4  ;;  %v1890_v61 = vld [vmem:[%s2758_s3 + $0x28] sm:$0xff]  }
  0x1e   :  { %v318_v16 = vadd.f32 %v1487_v9, %v1359_v7  ;;  %v1743_v19 = vunpack.c.l.bf16 %v1904_v5  ;;  %v670_v21 = vadd.f32 %v1679_v63, %v478_v11  ;;  %v319_v23 = vadd.f32 %v1488_v13, %v1360_v8  ;;  %v1844_v7 = vld [vmem:[%s2756_s1 + $0xa8] sm:$0xff]  }
  0x1f   :  { %1994 = vmatprep.mubr.msk.bf16.mxu1 %vm787_vm1, %v746_v10  ;;  %v671_v22 = vadd.f32 %v1680_v6, %v479_v12  ;;  %v1744_v24 = vunpack.c.h.bf16 %v1904_v5  ;;  %v1299_v27 = vunpack.c.l.bf16 %v1796_v14  ;;  %v1300_v28 = vunpack.c.h.bf16 %v1796_v14  ;;  %v1813_v6 = vld [vmem:[%s2755_s0 + $0xa8] sm:$0xff]  }
  0x20   :  { %v510_v26 = vadd.f32 %v1615_v17, %v318_v16  ;;  %v1427_v29 = vunpack.c.l.bf16 %v1827_v15  ;;  %v511_v32 = vadd.f32 %v1616_v18, %v319_v23  ;;  %v1428_v33 = vunpack.c.h.bf16 %v1827_v15  ;;  %v1875_v16 = vld [vmem:[%s2757_s2 + $0xa8] sm:$0xff]  }
  0x21   :  { %v731_v31 = vpack.c.bf16 %v671_v22, %v670_v21  ;;  %v1555_v34 = vunpack.c.l.bf16 %v1858_v20  ;;  %v1556_v38 = vunpack.c.h.bf16 %v1858_v20  ;;  %v1683_v39 = vunpack.c.l.bf16 %v1889_v25  ;;  %v1906_v17 = vld [vmem:[%s2758_s3 + $0xa8] sm:$0xff]  }
  0x22   :  { %v702_v36 = vadd.f32 %v1743_v19, %v510_v26  ;;  %v288_v37 = vadd.f32 %v1427_v29, %v1299_v27  ;;  %v703_v41 = vadd.f32 %v1744_v24, %v511_v32  ;;  %v289_v42 = vadd.f32 %v1428_v33, %v1300_v28  ;;  %v1798_v26 = vld [vmem:[%s2755_s0 + $0x30] sm:$0xff]  }
  0x23   :  { %1963 = vmatmul.mubr.msk.bf16.gmra.mxu0 %vm787_vm1, %v731_v31  ;;  %v1684_v43 = vunpack.c.h.bf16 %v1889_v25  ;;  %v1363_v44 = vunpack.c.l.bf16 %v1812_v30  ;;  %v1364_v47 = vunpack.c.h.bf16 %v1812_v30  ;;  %v1491_v48 = vunpack.c.l.bf16 %v1843_v35  ;;  %v1829_v27 = vld [vmem:[%s2756_s1 + $0x30] sm:$0xff]  }
  0x24   :  { %v480_v46 = vadd.f32 %v1555_v34, %v288_v37  ;;  %v1492_v49 = vunpack.c.h.bf16 %v1843_v35  ;;  %v747_v51 = vpack.c.bf16 %v703_v41, %v702_v36  ;;  %v481_v52 = vadd.f32 %v1556_v38, %v289_v42  ;;  %v1860_v32 = vld [vmem:[%s2757_s2 + $0x30] sm:$0xff]  }
  0x25   :  { %v1619_v53 = vunpack.c.l.bf16 %v1874_v40  ;;  %v1620_v54 = vunpack.c.h.bf16 %v1874_v40  ;;  %v320_v57 = vadd.f32 %v1491_v48, %v1363_v44  ;;  %v1747_v59 = vunpack.c.l.bf16 %v1905_v45  ;;  %v1891_v37 = vld [vmem:[%s2758_s3 + $0x30] sm:$0xff]  }
  0x26   :  { %v672_v56 = vadd.f32 %v1683_v39, %v480_v46  ;;  %v321_v58 = vadd.f32 %v1492_v49, %v1364_v47  ;;  %1995 = vmatmul.mubr.msk.bf16.gmra.mxu1 %vm787_vm1, %v747_v51  ;;  %v673_v62 = vadd.f32 %v1684_v43, %v481_v52  ;;  %v1748_v63 = vunpack.c.h.bf16 %v1905_v45  ;;  %v1814_v42 = vld [vmem:[%s2755_s0 + $0xb0] sm:$0xff]  }
  0x27   :  { %v1303_v0 = vunpack.c.l.bf16 %v1797_v50  ;;  %v1304_v1 = vunpack.c.h.bf16 %v1797_v50  ;;  %v512_v2 = vadd.f32 %v1619_v53, %v320_v57  ;;  %v1431_v4 = vunpack.c.l.bf16 %v1828_v55  ;;  %v1845_v47 = vld [vmem:[%s2756_s1 + $0xb0] sm:$0xff]  }
  0x28   :  { %v513_v3 = vadd.f32 %v1620_v54, %v321_v58  ;;  %v1432_v5 = vunpack.c.h.bf16 %v1828_v55  ;;  %v732_v8 = vpack.c.bf16 %v673_v62, %v672_v56  ;;  %v1559_v9 = vunpack.c.l.bf16 %v1859_v60  ;;  %v1876_v52 = vld [vmem:[%s2757_s2 + $0xb0] sm:$0xff]   ;;  %v1799_v62 = vld [vmem:[%s2755_s0 + $0x38] sm:$0xff]  }
  0x29   :  { %v1560_v10 = vunpack.c.h.bf16 %v1859_v60  ;;  %v1687_v11 = vunpack.c.l.bf16 %v1890_v61  ;;  %v704_v12 = vadd.f32 %v1747_v59, %v512_v2  ;;  %v290_v14 = vadd.f32 %v1431_v4, %v1303_v0  ;;  %v1907_v57 = vld [vmem:[%s2758_s3 + $0xb0] sm:$0xff]  }
  0x2a   :  { %v705_v13 = vadd.f32 %v1748_v63, %v513_v3  ;;  %v291_v15 = vadd.f32 %v1432_v5, %v1304_v1  ;;  %1966 = vmatprep.mubr.msk.bf16.mxu0 %vm787_vm1, %v732_v8  ;;  %v1688_v18 = vunpack.c.h.bf16 %v1890_v61  ;;  %v1367_v19 = vunpack.c.l.bf16 %v1813_v6  ;;  %v1830_v3 = vld [vmem:[%s2756_s1 + $0x38] sm:$0xff]  }
  0x2b   :  { %v1368_v20 = vunpack.c.h.bf16 %v1813_v6  ;;  %v1495_v21 = vunpack.c.l.bf16 %v1844_v7  ;;  %v482_v23 = vadd.f32 %v1559_v9, %v290_v14  ;;  %v1496_v25 = vunpack.c.h.bf16 %v1844_v7  ;;  %v1861_v8 = vld [vmem:[%s2757_s2 + $0x38] sm:$0xff]  }
  0x2c   :  { %v748_v22 = vpack.c.bf16 %v705_v13, %v704_v12  ;;  %v483_v24 = vadd.f32 %v1560_v10, %v291_v15  ;;  %v1623_v29 = vunpack.c.l.bf16 %v1875_v16  ;;  %v1624_v30 = vunpack.c.h.bf16 %v1875_v16  ;;  %v1892_v9 = vld [vmem:[%s2758_s3 + $0x38] sm:$0xff]  }
  0x2d   :  { %v322_v28 = vadd.f32 %v1495_v21, %v1367_v19  ;;  %v1751_v31 = vunpack.c.l.bf16 %v1906_v17  ;;  %v674_v33 = vadd.f32 %v1687_v11, %v482_v23  ;;  %v323_v35 = vadd.f32 %v1496_v25, %v1368_v20  ;;  %v1846_v19 = vld [vmem:[%s2756_s1 + $0xb8] sm:$0xff]  }
  0x2e   :  { %1998 = vmatprep.mubr.msk.bf16.mxu1 %vm787_vm1, %v748_v22  ;;  %v675_v34 = vadd.f32 %v1688_v18, %v483_v24  ;;  %v1752_v36 = vunpack.c.h.bf16 %v1906_v17  ;;  %v1307_v39 = vunpack.c.l.bf16 %v1798_v26  ;;  %v1308_v40 = vunpack.c.h.bf16 %v1798_v26  ;;  %v1815_v18 = vld [vmem:[%s2755_s0 + $0xb8] sm:$0xff]  }
  0x2f   :  { %v514_v38 = vadd.f32 %v1623_v29, %v322_v28  ;;  %v1435_v41 = vunpack.c.l.bf16 %v1829_v27  ;;  %v515_v44 = vadd.f32 %v1624_v30, %v323_v35  ;;  %v1436_v45 = vunpack.c.h.bf16 %v1829_v27  ;;  %v1877_v28 = vld [vmem:[%s2757_s2 + $0xb8] sm:$0xff]  }
  0x30   :  { %v733_v43 = vpack.c.bf16 %v675_v34, %v674_v33  ;;  %v1563_v46 = vunpack.c.l.bf16 %v1860_v32  ;;  %v1564_v50 = vunpack.c.h.bf16 %v1860_v32  ;;  %v1691_v51 = vunpack.c.l.bf16 %v1891_v37  ;;  %v1908_v29 = vld [vmem:[%s2758_s3 + $0xb8] sm:$0xff]  }
  0x31   :  { %v706_v48 = vadd.f32 %v1751_v31, %v514_v38  ;;  %v292_v49 = vadd.f32 %v1435_v41, %v1307_v39  ;;  %v707_v53 = vadd.f32 %v1752_v36, %v515_v44  ;;  %v293_v54 = vadd.f32 %v1436_v45, %v1308_v40  ;;  %v1800_v38 = vld [vmem:[%s2755_s0 + $0x40] sm:$0xff]  }
  0x32   :  { %1967 = vmatmul.mubr.msk.bf16.gmra.mxu0 %vm787_vm1, %v733_v43  ;;  %v1692_v55 = vunpack.c.h.bf16 %v1891_v37  ;;  %v1371_v56 = vunpack.c.l.bf16 %v1814_v42  ;;  %v1372_v59 = vunpack.c.h.bf16 %v1814_v42  ;;  %v1499_v60 = vunpack.c.l.bf16 %v1845_v47  ;;  %v1831_v39 = vld [vmem:[%s2756_s1 + $0x40] sm:$0xff]  }
  0x33   :  { %v484_v58 = vadd.f32 %v1563_v46, %v292_v49  ;;  %v1500_v61 = vunpack.c.h.bf16 %v1845_v47  ;;  %v749_v63 = vpack.c.bf16 %v707_v53, %v706_v48  ;;  %v485_v0 = vadd.f32 %v1564_v50, %v293_v54  ;;  %v1862_v44 = vld [vmem:[%s2757_s2 + $0x40] sm:$0xff]  }
  0x34   :  { %v1627_v1 = vunpack.c.l.bf16 %v1876_v52  ;;  %v1628_v2 = vunpack.c.h.bf16 %v1876_v52  ;;  %v324_v5 = vadd.f32 %v1499_v60, %v1371_v56  ;;  %v1755_v7 = vunpack.c.l.bf16 %v1907_v57  ;;  %v1893_v49 = vld [vmem:[%s2758_s3 + $0x40] sm:$0xff]  }
  0x35   :  { %v676_v4 = vadd.f32 %v1691_v51, %v484_v58  ;;  %v325_v6 = vadd.f32 %v1500_v61, %v1372_v59  ;;  %1999 = vmatmul.mubr.msk.bf16.gmra.mxu1 %vm787_vm1, %v749_v63  ;;  %v677_v10 = vadd.f32 %v1692_v55, %v485_v0  ;;  %v1756_v11 = vunpack.c.h.bf16 %v1907_v57  ;;  %v1816_v54 = vld [vmem:[%s2755_s0 + $0xc0] sm:$0xff]  }
  0x36   :  { %v1311_v12 = vunpack.c.l.bf16 %v1799_v62  ;;  %v1312_v13 = vunpack.c.h.bf16 %v1799_v62  ;;  %v516_v14 = vadd.f32 %v1627_v1, %v324_v5  ;;  %v1439_v16 = vunpack.c.l.bf16 %v1830_v3  ;;  %v1847_v59 = vld [vmem:[%s2756_s1 + $0xc0] sm:$0xff]  }
  0x37   :  { %v517_v15 = vadd.f32 %v1628_v2, %v325_v6  ;;  %v1440_v17 = vunpack.c.h.bf16 %v1830_v3  ;;  %v734_v20 = vpack.c.bf16 %v677_v10, %v676_v4  ;;  %v1567_v21 = vunpack.c.l.bf16 %v1861_v8  ;;  %v1878_v0 = vld [vmem:[%s2757_s2 + $0xc0] sm:$0xff]   ;;  %v1801_v10 = vld [vmem:[%s2755_s0 + $0x48] sm:$0xff]  }
  0x38   :  { %v1568_v22 = vunpack.c.h.bf16 %v1861_v8  ;;  %v1695_v23 = vunpack.c.l.bf16 %v1892_v9  ;;  %v708_v24 = vadd.f32 %v1755_v7, %v516_v14  ;;  %v294_v26 = vadd.f32 %v1439_v16, %v1311_v12  ;;  %v1909_v5 = vld [vmem:[%s2758_s3 + $0xc0] sm:$0xff]  }
  0x39   :  { %v709_v25 = vadd.f32 %v1756_v11, %v517_v15  ;;  %v295_v27 = vadd.f32 %v1440_v17, %v1312_v13  ;;  %1970 = vmatprep.mubr.msk.bf16.mxu0 %vm787_vm1, %v734_v20  ;;  %v1696_v30 = vunpack.c.h.bf16 %v1892_v9  ;;  %v1375_v31 = vunpack.c.l.bf16 %v1815_v18  ;;  %v1832_v15 = vld [vmem:[%s2756_s1 + $0x48] sm:$0xff]  }
  0x3a   :  { %v1376_v32 = vunpack.c.h.bf16 %v1815_v18  ;;  %v1503_v33 = vunpack.c.l.bf16 %v1846_v19  ;;  %v486_v35 = vadd.f32 %v1567_v21, %v294_v26  ;;  %v1504_v37 = vunpack.c.h.bf16 %v1846_v19  ;;  %v1863_v20 = vld [vmem:[%s2757_s2 + $0x48] sm:$0xff]  }
  0x3b   :  { %v750_v34 = vpack.c.bf16 %v709_v25, %v708_v24  ;;  %v487_v36 = vadd.f32 %v1568_v22, %v295_v27  ;;  %v1631_v41 = vunpack.c.l.bf16 %v1877_v28  ;;  %v1632_v42 = vunpack.c.h.bf16 %v1877_v28  ;;  %v1894_v21 = vld [vmem:[%s2758_s3 + $0x48] sm:$0xff]  }
  0x3c   :  { %v326_v40 = vadd.f32 %v1503_v33, %v1375_v31  ;;  %v1759_v43 = vunpack.c.l.bf16 %v1908_v29  ;;  %v678_v45 = vadd.f32 %v1695_v23, %v486_v35  ;;  %v327_v47 = vadd.f32 %v1504_v37, %v1376_v32  ;;  %v1848_v31 = vld [vmem:[%s2756_s1 + $0xc8] sm:$0xff]  }
  0x3d   :  { %2002 = vmatprep.mubr.msk.bf16.mxu1 %vm787_vm1, %v750_v34  ;;  %v679_v46 = vadd.f32 %v1696_v30, %v487_v36  ;;  %v1760_v48 = vunpack.c.h.bf16 %v1908_v29  ;;  %v1315_v51 = vunpack.c.l.bf16 %v1800_v38  ;;  %v1316_v52 = vunpack.c.h.bf16 %v1800_v38  ;;  %v1817_v30 = vld [vmem:[%s2755_s0 + $0xc8] sm:$0xff]  }
  0x3e   :  { %v518_v50 = vadd.f32 %v1631_v41, %v326_v40  ;;  %v1443_v53 = vunpack.c.l.bf16 %v1831_v39  ;;  %v519_v56 = vadd.f32 %v1632_v42, %v327_v47  ;;  %v1444_v57 = vunpack.c.h.bf16 %v1831_v39  ;;  %v1879_v40 = vld [vmem:[%s2757_s2 + $0xc8] sm:$0xff]  }
  0x3f   :  { %v735_v55 = vpack.c.bf16 %v679_v46, %v678_v45  ;;  %v1571_v58 = vunpack.c.l.bf16 %v1862_v44  ;;  %v1572_v62 = vunpack.c.h.bf16 %v1862_v44  ;;  %v1699_v63 = vunpack.c.l.bf16 %v1893_v49  ;;  %v1910_v41 = vld [vmem:[%s2758_s3 + $0xc8] sm:$0xff]  }
  0x40   :  { %v710_v60 = vadd.f32 %v1759_v43, %v518_v50  ;;  %v296_v61 = vadd.f32 %v1443_v53, %v1315_v51  ;;  %v711_v1 = vadd.f32 %v1760_v48, %v519_v56  ;;  %v297_v2 = vadd.f32 %v1444_v57, %v1316_v52  ;;  %v1802_v50 = vld [vmem:[%s2755_s0 + $0x50] sm:$0xff]  }
  0x41   :  { %1971 = vmatmul.mubr.msk.bf16.gmra.mxu0 %vm787_vm1, %v735_v55  ;;  %v1700_v3 = vunpack.c.h.bf16 %v1893_v49  ;;  %v1379_v4 = vunpack.c.l.bf16 %v1816_v54  ;;  %v1380_v7 = vunpack.c.h.bf16 %v1816_v54  ;;  %v1507_v8 = vunpack.c.l.bf16 %v1847_v59  ;;  %v1833_v51 = vld [vmem:[%s2756_s1 + $0x50] sm:$0xff]  }
  0x42   :  { %v488_v6 = vadd.f32 %v1571_v58, %v296_v61  ;;  %v1508_v9 = vunpack.c.h.bf16 %v1847_v59  ;;  %v751_v11 = vpack.c.bf16 %v711_v1, %v710_v60  ;;  %v489_v12 = vadd.f32 %v1572_v62, %v297_v2  ;;  %v1864_v56 = vld [vmem:[%s2757_s2 + $0x50] sm:$0xff]  }
  0x43   :  { %v1635_v13 = vunpack.c.l.bf16 %v1878_v0  ;;  %v1636_v14 = vunpack.c.h.bf16 %v1878_v0  ;;  %v328_v17 = vadd.f32 %v1507_v8, %v1379_v4  ;;  %v1763_v19 = vunpack.c.l.bf16 %v1909_v5  ;;  %v1895_v61 = vld [vmem:[%s2758_s3 + $0x50] sm:$0xff]  }
  0x44   :  { %v680_v16 = vadd.f32 %v1699_v63, %v488_v6  ;;  %v329_v18 = vadd.f32 %v1508_v9, %v1380_v7  ;;  %2003 = vmatmul.mubr.msk.bf16.gmra.mxu1 %vm787_vm1, %v751_v11  ;;  %v681_v22 = vadd.f32 %v1700_v3, %v489_v12  ;;  %v1764_v23 = vunpack.c.h.bf16 %v1909_v5  ;;  %v1818_v2 = vld [vmem:[%s2755_s0 + $0xd0] sm:$0xff]  }
  0x45   :  { %v1319_v24 = vunpack.c.l.bf16 %v1801_v10  ;;  %v1320_v25 = vunpack.c.h.bf16 %v1801_v10  ;;  %v520_v26 = vadd.f32 %v1635_v13, %v328_v17  ;;  %v1447_v28 = vunpack.c.l.bf16 %v1832_v15  ;;  %v1849_v7 = vld [vmem:[%s2756_s1 + $0xd0] sm:$0xff]  }
  0x46   :  { %v521_v27 = vadd.f32 %v1636_v14, %v329_v18  ;;  %v1448_v29 = vunpack.c.h.bf16 %v1832_v15  ;;  %v736_v32 = vpack.c.bf16 %v681_v22, %v680_v16  ;;  %v1575_v33 = vunpack.c.l.bf16 %v1863_v20  ;;  %v1880_v12 = vld [vmem:[%s2757_s2 + $0xd0] sm:$0xff]   ;;  %v1803_v22 = vld [vmem:[%s2755_s0 + $0x58] sm:$0xff]  }
  0x47   :  { %v1576_v34 = vunpack.c.h.bf16 %v1863_v20  ;;  %v1703_v35 = vunpack.c.l.bf16 %v1894_v21  ;;  %v712_v36 = vadd.f32 %v1763_v19, %v520_v26  ;;  %v298_v38 = vadd.f32 %v1447_v28, %v1319_v24  ;;  %v1911_v17 = vld [vmem:[%s2758_s3 + $0xd0] sm:$0xff]  }
  0x48   :  { %v713_v37 = vadd.f32 %v1764_v23, %v521_v27  ;;  %v299_v39 = vadd.f32 %v1448_v29, %v1320_v25  ;;  %1974 = vmatprep.mubr.msk.bf16.mxu0 %vm787_vm1, %v736_v32  ;;  %v1704_v42 = vunpack.c.h.bf16 %v1894_v21  ;;  %v1383_v43 = vunpack.c.l.bf16 %v1817_v30  ;;  %v1834_v27 = vld [vmem:[%s2756_s1 + $0x58] sm:$0xff]  }
  0x49   :  { %v1384_v44 = vunpack.c.h.bf16 %v1817_v30  ;;  %v1511_v45 = vunpack.c.l.bf16 %v1848_v31  ;;  %v490_v47 = vadd.f32 %v1575_v33, %v298_v38  ;;  %v1512_v49 = vunpack.c.h.bf16 %v1848_v31  ;;  %v1865_v32 = vld [vmem:[%s2757_s2 + $0x58] sm:$0xff]  }
  0x4a   :  { %v752_v46 = vpack.c.bf16 %v713_v37, %v712_v36  ;;  %v491_v48 = vadd.f32 %v1576_v34, %v299_v39  ;;  %v1639_v53 = vunpack.c.l.bf16 %v1879_v40  ;;  %v1640_v54 = vunpack.c.h.bf16 %v1879_v40  ;;  %v1896_v33 = vld [vmem:[%s2758_s3 + $0x58] sm:$0xff]  }
  0x4b   :  { %v330_v52 = vadd.f32 %v1511_v45, %v1383_v43  ;;  %v1767_v55 = vunpack.c.l.bf16 %v1910_v41  ;;  %v682_v57 = vadd.f32 %v1703_v35, %v490_v47  ;;  %v331_v59 = vadd.f32 %v1512_v49, %v1384_v44  ;;  %v1850_v43 = vld [vmem:[%s2756_s1 + $0xd8] sm:$0xff]  }
  0x4c   :  { %2006 = vmatprep.mubr.msk.bf16.mxu1 %vm787_vm1, %v752_v46  ;;  %v683_v58 = vadd.f32 %v1704_v42, %v491_v48  ;;  %v1768_v60 = vunpack.c.h.bf16 %v1910_v41  ;;  %v1323_v63 = vunpack.c.l.bf16 %v1802_v50  ;;  %v1324_v0 = vunpack.c.h.bf16 %v1802_v50  ;;  %v1819_v42 = vld [vmem:[%s2755_s0 + $0xd8] sm:$0xff]  }
  0x4d   :  { %v522_v62 = vadd.f32 %v1639_v53, %v330_v52  ;;  %v1451_v1 = vunpack.c.l.bf16 %v1833_v51  ;;  %v523_v4 = vadd.f32 %v1640_v54, %v331_v59  ;;  %v1452_v5 = vunpack.c.h.bf16 %v1833_v51  ;;  %v1881_v52 = vld [vmem:[%s2757_s2 + $0xd8] sm:$0xff]  }
  0x4e   :  { %v737_v3 = vpack.c.bf16 %v683_v58, %v682_v57  ;;  %v1579_v6 = vunpack.c.l.bf16 %v1864_v56  ;;  %v1580_v10 = vunpack.c.h.bf16 %v1864_v56  ;;  %v1707_v11 = vunpack.c.l.bf16 %v1895_v61  ;;  %v1912_v53 = vld [vmem:[%s2758_s3 + $0xd8] sm:$0xff]  }
  0x4f   :  { %v714_v8 = vadd.f32 %v1767_v55, %v522_v62  ;;  %v300_v9 = vadd.f32 %v1451_v1, %v1323_v63  ;;  %v715_v13 = vadd.f32 %v1768_v60, %v523_v4  ;;  %v301_v14 = vadd.f32 %v1452_v5, %v1324_v0  ;;  %v1804_v62 = vld [vmem:[%s2755_s0 + $0x60] sm:$0xff]  }
  0x50   :  { %1975 = vmatmul.mubr.msk.bf16.gmra.mxu0 %vm787_vm1, %v737_v3  ;;  %v1708_v15 = vunpack.c.h.bf16 %v1895_v61  ;;  %v1387_v16 = vunpack.c.l.bf16 %v1818_v2  ;;  %v1388_v19 = vunpack.c.h.bf16 %v1818_v2  ;;  %v1515_v20 = vunpack.c.l.bf16 %v1849_v7  ;;  %v1835_v63 = vld [vmem:[%s2756_s1 + $0x60] sm:$0xff]  }
  0x51   :  { %v492_v18 = vadd.f32 %v1579_v6, %v300_v9  ;;  %v1516_v21 = vunpack.c.h.bf16 %v1849_v7  ;;  %v753_v23 = vpack.c.bf16 %v715_v13, %v714_v8  ;;  %v493_v24 = vadd.f32 %v1580_v10, %v301_v14  ;;  %v1866_v4 = vld [vmem:[%s2757_s2 + $0x60] sm:$0xff]  }
  0x52   :  { %v1643_v25 = vunpack.c.l.bf16 %v1880_v12  ;;  %v1644_v26 = vunpack.c.h.bf16 %v1880_v12  ;;  %v332_v29 = vadd.f32 %v1515_v20, %v1387_v16  ;;  %v1771_v31 = vunpack.c.l.bf16 %v1911_v17  ;;  %v1897_v9 = vld [vmem:[%s2758_s3 + $0x60] sm:$0xff]  }
  0x53   :  { %v684_v28 = vadd.f32 %v1707_v11, %v492_v18  ;;  %v333_v30 = vadd.f32 %v1516_v21, %v1388_v19  ;;  %2007 = vmatmul.mubr.msk.bf16.gmra.mxu1 %vm787_vm1, %v753_v23  ;;  %v685_v34 = vadd.f32 %v1708_v15, %v493_v24  ;;  %v1772_v35 = vunpack.c.h.bf16 %v1911_v17  ;;  %v1820_v14 = vld [vmem:[%s2755_s0 + $0xe0] sm:$0xff]  }
  0x54   :  { %v1327_v36 = vunpack.c.l.bf16 %v1803_v22  ;;  %v1328_v37 = vunpack.c.h.bf16 %v1803_v22  ;;  %v524_v38 = vadd.f32 %v1643_v25, %v332_v29  ;;  %v1455_v40 = vunpack.c.l.bf16 %v1834_v27  ;;  %v1851_v19 = vld [vmem:[%s2756_s1 + $0xe0] sm:$0xff]  }
  0x55   :  { %v525_v39 = vadd.f32 %v1644_v26, %v333_v30  ;;  %v1456_v41 = vunpack.c.h.bf16 %v1834_v27  ;;  %v738_v44 = vpack.c.bf16 %v685_v34, %v684_v28  ;;  %v1583_v45 = vunpack.c.l.bf16 %v1865_v32  ;;  %v1882_v24 = vld [vmem:[%s2757_s2 + $0xe0] sm:$0xff]   ;;  %v1805_v34 = vld [vmem:[%s2755_s0 + $0x68] sm:$0xff]  }
  0x56   :  { %v1584_v46 = vunpack.c.h.bf16 %v1865_v32  ;;  %v1711_v47 = vunpack.c.l.bf16 %v1896_v33  ;;  %v716_v48 = vadd.f32 %v1771_v31, %v524_v38  ;;  %v302_v50 = vadd.f32 %v1455_v40, %v1327_v36  ;;  %v1913_v29 = vld [vmem:[%s2758_s3 + $0xe0] sm:$0xff]  }
  0x57   :  { %v717_v49 = vadd.f32 %v1772_v35, %v525_v39  ;;  %v303_v51 = vadd.f32 %v1456_v41, %v1328_v37  ;;  %1978 = vmatprep.mubr.msk.bf16.mxu0 %vm787_vm1, %v738_v44  ;;  %v1712_v54 = vunpack.c.h.bf16 %v1896_v33  ;;  %v1391_v55 = vunpack.c.l.bf16 %v1819_v42  ;;  %v1836_v39 = vld [vmem:[%s2756_s1 + $0x68] sm:$0xff]  }
  0x58   :  { %v1392_v56 = vunpack.c.h.bf16 %v1819_v42  ;;  %v1519_v57 = vunpack.c.l.bf16 %v1850_v43  ;;  %v494_v59 = vadd.f32 %v1583_v45, %v302_v50  ;;  %v1520_v61 = vunpack.c.h.bf16 %v1850_v43  ;;  %v1867_v44 = vld [vmem:[%s2757_s2 + $0x68] sm:$0xff]  }
  0x59   :  { %v754_v58 = vpack.c.bf16 %v717_v49, %v716_v48  ;;  %v495_v60 = vadd.f32 %v1584_v46, %v303_v51  ;;  %v1647_v1 = vunpack.c.l.bf16 %v1881_v52  ;;  %v1648_v2 = vunpack.c.h.bf16 %v1881_v52  ;;  %v1898_v45 = vld [vmem:[%s2758_s3 + $0x68] sm:$0xff]  }
  0x5a   :  { %v334_v0 = vadd.f32 %v1519_v57, %v1391_v55  ;;  %v1775_v3 = vunpack.c.l.bf16 %v1912_v53  ;;  %v686_v5 = vadd.f32 %v1711_v47, %v494_v59  ;;  %v335_v7 = vadd.f32 %v1520_v61, %v1392_v56  ;;  %v1852_v55 = vld [vmem:[%s2756_s1 + $0xe8] sm:$0xff]  }
  0x5b   :  { %2010 = vmatprep.mubr.msk.bf16.mxu1 %vm787_vm1, %v754_v58  ;;  %v687_v6 = vadd.f32 %v1712_v54, %v495_v60  ;;  %v1776_v8 = vunpack.c.h.bf16 %v1912_v53  ;;  %v1331_v11 = vunpack.c.l.bf16 %v1804_v62  ;;  %v1332_v12 = vunpack.c.h.bf16 %v1804_v62  ;;  %v1821_v54 = vld [vmem:[%s2755_s0 + $0xe8] sm:$0xff]  }
  0x5c   :  { %v526_v10 = vadd.f32 %v1647_v1, %v334_v0  ;;  %v1459_v13 = vunpack.c.l.bf16 %v1835_v63  ;;  %v527_v16 = vadd.f32 %v1648_v2, %v335_v7  ;;  %v1460_v17 = vunpack.c.h.bf16 %v1835_v63  ;;  %v1883_v0 = vld [vmem:[%s2757_s2 + $0xe8] sm:$0xff]  }
  0x5d   :  { %v739_v15 = vpack.c.bf16 %v687_v6, %v686_v5  ;;  %v1587_v18 = vunpack.c.l.bf16 %v1866_v4  ;;  %v1588_v22 = vunpack.c.h.bf16 %v1866_v4  ;;  %v1715_v23 = vunpack.c.l.bf16 %v1897_v9  ;;  %v1914_v1 = vld [vmem:[%s2758_s3 + $0xe8] sm:$0xff]  }
  0x5e   :  { %v718_v20 = vadd.f32 %v1775_v3, %v526_v10  ;;  %v304_v21 = vadd.f32 %v1459_v13, %v1331_v11  ;;  %v719_v25 = vadd.f32 %v1776_v8, %v527_v16  ;;  %v305_v26 = vadd.f32 %v1460_v17, %v1332_v12  ;;  %v1806_v10 = vld [vmem:[%s2755_s0 + $0x70] sm:$0xff]  }
  0x5f   :  { %1979 = vmatmul.mubr.msk.bf16.gmra.mxu0 %vm787_vm1, %v739_v15  ;;  %v1716_v27 = vunpack.c.h.bf16 %v1897_v9  ;;  %v1395_v28 = vunpack.c.l.bf16 %v1820_v14  ;;  %v1396_v31 = vunpack.c.h.bf16 %v1820_v14  ;;  %v1523_v32 = vunpack.c.l.bf16 %v1851_v19  ;;  %v1837_v11 = vld [vmem:[%s2756_s1 + $0x70] sm:$0xff]  }
  0x60   :  { %v496_v30 = vadd.f32 %v1587_v18, %v304_v21  ;;  %v1524_v33 = vunpack.c.h.bf16 %v1851_v19  ;;  %v755_v35 = vpack.c.bf16 %v719_v25, %v718_v20  ;;  %v497_v36 = vadd.f32 %v1588_v22, %v305_v26  ;;  %v1868_v16 = vld [vmem:[%s2757_s2 + $0x70] sm:$0xff]  }
  0x61   :  { %v1651_v37 = vunpack.c.l.bf16 %v1882_v24  ;;  %v1652_v38 = vunpack.c.h.bf16 %v1882_v24  ;;  %v336_v41 = vadd.f32 %v1523_v32, %v1395_v28  ;;  %v1779_v43 = vunpack.c.l.bf16 %v1913_v29  ;;  %v1899_v21 = vld [vmem:[%s2758_s3 + $0x70] sm:$0xff]  }
  0x62   :  { %v688_v40 = vadd.f32 %v1715_v23, %v496_v30  ;;  %v337_v42 = vadd.f32 %v1524_v33, %v1396_v31  ;;  %2011 = vmatmul.mubr.msk.bf16.gmra.mxu1 %vm787_vm1, %v755_v35  ;;  %v689_v46 = vadd.f32 %v1716_v27, %v497_v36  ;;  %v1780_v47 = vunpack.c.h.bf16 %v1913_v29  ;;  %v1822_v26 = vld [vmem:[%s2755_s0 + $0xf0] sm:$0xff]  }
  0x63   :  { %v1335_v48 = vunpack.c.l.bf16 %v1805_v34  ;;  %v1336_v49 = vunpack.c.h.bf16 %v1805_v34  ;;  %v528_v50 = vadd.f32 %v1651_v37, %v336_v41  ;;  %v1463_v52 = vunpack.c.l.bf16 %v1836_v39  ;;  %v1853_v31 = vld [vmem:[%s2756_s1 + $0xf0] sm:$0xff]  }
  0x64   :  { %v529_v51 = vadd.f32 %v1652_v38, %v337_v42  ;;  %v1464_v53 = vunpack.c.h.bf16 %v1836_v39  ;;  %v740_v56 = vpack.c.bf16 %v689_v46, %v688_v40  ;;  %v1591_v57 = vunpack.c.l.bf16 %v1867_v44  ;;  %v1884_v36 = vld [vmem:[%s2757_s2 + $0xf0] sm:$0xff]   ;;  %v1807_v46 = vld [vmem:[%s2755_s0 + $0x78] sm:$0xff]  }
  0x65   :  { %v1592_v58 = vunpack.c.h.bf16 %v1867_v44  ;;  %v1719_v59 = vunpack.c.l.bf16 %v1898_v45  ;;  %v720_v60 = vadd.f32 %v1779_v43, %v528_v50  ;;  %v306_v62 = vadd.f32 %v1463_v52, %v1335_v48  ;;  %v1915_v41 = vld [vmem:[%s2758_s3 + $0xf0] sm:$0xff]  }
  0x66   :  { %v721_v61 = vadd.f32 %v1780_v47, %v529_v51  ;;  %v307_v63 = vadd.f32 %v1464_v53, %v1336_v49  ;;  %1982 = vmatprep.mubr.msk.bf16.mxu0 %vm787_vm1, %v740_v56  ;;  %v1720_v2 = vunpack.c.h.bf16 %v1898_v45  ;;  %v1399_v3 = vunpack.c.l.bf16 %v1821_v54  ;;  %v1838_v51 = vld [vmem:[%s2756_s1 + $0x78] sm:$0xff]  }
  0x67   :  { %v1400_v4 = vunpack.c.h.bf16 %v1821_v54  ;;  %v1527_v5 = vunpack.c.l.bf16 %v1852_v55  ;;  %v498_v7 = vadd.f32 %v1591_v57, %v306_v62  ;;  %v1528_v9 = vunpack.c.h.bf16 %v1852_v55  ;;  %v1869_v56 = vld [vmem:[%s2757_s2 + $0x78] sm:$0xff]  }
  0x68   :  { %v756_v6 = vpack.c.bf16 %v721_v61, %v720_v60  ;;  %v499_v8 = vadd.f32 %v1592_v58, %v307_v63  ;;  %v1655_v13 = vunpack.c.l.bf16 %v1883_v0  ;;  %v1656_v14 = vunpack.c.h.bf16 %v1883_v0  ;;  %v1900_v57 = vld [vmem:[%s2758_s3 + $0x78] sm:$0xff]  }
  0x69   :  { %v338_v12 = vadd.f32 %v1527_v5, %v1399_v3  ;;  %v1783_v15 = vunpack.c.l.bf16 %v1914_v1  ;;  %v690_v17 = vadd.f32 %v1719_v59, %v498_v7  ;;  %v339_v19 = vadd.f32 %v1528_v9, %v1400_v4  ;;  %v1854_v3 = vld [vmem:[%s2756_s1 + $0xf8] sm:$0xff]  }
  0x6a   :  { %2014 = vmatprep.mubr.msk.bf16.mxu1 %vm787_vm1, %v756_v6  ;;  %v691_v18 = vadd.f32 %v1720_v2, %v499_v8  ;;  %v1784_v20 = vunpack.c.h.bf16 %v1914_v1  ;;  %v1339_v23 = vunpack.c.l.bf16 %v1806_v10  ;;  %v1340_v24 = vunpack.c.h.bf16 %v1806_v10  ;;  %v1823_v2 = vld [vmem:[%s2755_s0 + $0xf8] sm:$0xff]  }
  0x6b   :  { %v530_v22 = vadd.f32 %v1655_v13, %v338_v12  ;;  %v1467_v25 = vunpack.c.l.bf16 %v1837_v11  ;;  %v531_v28 = vadd.f32 %v1656_v14, %v339_v19  ;;  %v1468_v29 = vunpack.c.h.bf16 %v1837_v11  ;;  %v1885_v12 = vld [vmem:[%s2757_s2 + $0xf8] sm:$0xff]  }
  0x6c   :  { %v741_v27 = vpack.c.bf16 %v691_v18, %v690_v17  ;;  %v1595_v30 = vunpack.c.l.bf16 %v1868_v16  ;;  %v1596_v34 = vunpack.c.h.bf16 %v1868_v16  ;;  %v1723_v35 = vunpack.c.l.bf16 %v1899_v21  ;;  %v1916_v13 = vld [vmem:[%s2758_s3 + $0xf8] sm:$0xff]  }
  0x6d   :  { %v722_v32 = vadd.f32 %v1783_v15, %v530_v22  ;;  %v308_v33 = vadd.f32 %v1467_v25, %v1339_v23  ;;  %v723_v37 = vadd.f32 %v1784_v20, %v531_v28  ;;  %v309_v38 = vadd.f32 %v1468_v29, %v1340_v24 }
  0x6e   :  { %1983 = vmatmul.mubr.msk.bf16.gmra.mxu0 %vm787_vm1, %v741_v27  ;;  %v1724_v39 = vunpack.c.h.bf16 %v1899_v21  ;;  %v1403_v40 = vunpack.c.l.bf16 %v1822_v26  ;;  %v1404_v43 = vunpack.c.h.bf16 %v1822_v26  ;;  %v1531_v44 = vunpack.c.l.bf16 %v1853_v31 }
  0x6f   :  { %v500_v42 = vadd.f32 %v1595_v30, %v308_v33  ;;  %v1532_v45 = vunpack.c.h.bf16 %v1853_v31  ;;  %v757_v47 = vpack.c.bf16 %v723_v37, %v722_v32  ;;  %v501_v48 = vadd.f32 %v1596_v34, %v309_v38 }
  0x70   :  { %v1659_v49 = vunpack.c.l.bf16 %v1884_v36  ;;  %v1660_v50 = vunpack.c.h.bf16 %v1884_v36  ;;  %v340_v53 = vadd.f32 %v1531_v44, %v1403_v40  ;;  %v1787_v55 = vunpack.c.l.bf16 %v1915_v41  ;;  %v2496_v36 = vld [vmem:[%s2759_s5] ss:$0 sm:$0xff] }
  0x71   :  { %v692_v52 = vadd.f32 %v1723_v35, %v500_v42  ;;  %v341_v54 = vadd.f32 %v1532_v45, %v1404_v43  ;;  %2015 = vmatmul.mubr.msk.bf16.gmra.mxu1 %vm787_vm1, %v757_v47  ;;  %v693_v58 = vadd.f32 %v1724_v39, %v501_v48  ;;  %v1788_v59 = vunpack.c.h.bf16 %v1915_v41 }
  0x72   :  { %v1343_v60 = vunpack.c.l.bf16 %v1807_v46  ;;  %v1344_v61 = vunpack.c.h.bf16 %v1807_v46  ;;  %v532_v62 = vadd.f32 %v1659_v49, %v340_v53  ;;  %v1471_v0 = vunpack.c.l.bf16 %v1838_v51 }
  0x73   :  { %v533_v63 = vadd.f32 %v1660_v50, %v341_v54  ;;  %v1472_v1 = vunpack.c.h.bf16 %v1838_v51  ;;  %v742_v4 = vpack.c.bf16 %v693_v58, %v692_v52  ;;  %v1599_v5 = vunpack.c.l.bf16 %v1869_v56 }
  0x74   :  { %v1600_v6 = vunpack.c.h.bf16 %v1869_v56  ;;  %v1727_v7 = vunpack.c.l.bf16 %v1900_v57  ;;  %v724_v8 = vadd.f32 %v1787_v55, %v532_v62  ;;  %v310_v10 = vadd.f32 %v1471_v0, %v1343_v60 }
  0x75   :  { %v725_v9 = vadd.f32 %v1788_v59, %v533_v63  ;;  %v311_v11 = vadd.f32 %v1472_v1, %v1344_v61  ;;  %1986 = vmatprep.mubr.msk.bf16.mxu0 %vm787_vm1, %v742_v4  ;;  %v1728_v14 = vunpack.c.h.bf16 %v1900_v57  ;;  %v1407_v15 = vunpack.c.l.bf16 %v1823_v2 }
  0x76   :  { %v1408_v16 = vunpack.c.h.bf16 %v1823_v2  ;;  %v1535_v17 = vunpack.c.l.bf16 %v1854_v3  ;;  %v502_v19 = vadd.f32 %v1599_v5, %v310_v10  ;;  %v1536_v21 = vunpack.c.h.bf16 %v1854_v3 }
  0x77   :  { %v758_v18 = vpack.c.bf16 %v725_v9, %v724_v8  ;;  %v503_v20 = vadd.f32 %v1600_v6, %v311_v11  ;;  %v1663_v23 = vunpack.c.l.bf16 %v1885_v12  ;;  %v1664_v24 = vunpack.c.h.bf16 %v1885_v12 }
  0x78   :  { %v342_v22 = vadd.f32 %v1535_v17, %v1407_v15  ;;  %v1791_v25 = vunpack.c.l.bf16 %v1916_v13  ;;  %v694_v26 = vadd.f32 %v1727_v7, %v502_v19  ;;  %v343_v28 = vadd.f32 %v1536_v21, %v1408_v16 }
  0x79   :  { %2018 = vmatprep.mubr.msk.bf16.mxu1 %vm787_vm1, %v758_v18  ;;  %v695_v27 = vadd.f32 %v1728_v14, %v503_v20  ;;  %v1792_v29 = vunpack.c.h.bf16 %v1916_v13 }
  0x7a   :  { %v534_v30 = vadd.f32 %v1663_v23, %v342_v22  ;;  %v535_v32 = vadd.f32 %v1664_v24, %v343_v28 }
  0x7b   :  { %v743_v31 = vpack.c.bf16 %v695_v27, %v694_v26 }
  0x7c   :  { %v726_v33 = vadd.f32 %v1791_v25, %v534_v30  ;;  %v727_v34 = vadd.f32 %v1792_v29, %v535_v32 }
  0x7d   :  { %1987 = vmatmul.mubr.msk.bf16.gmra.mxu0 %vm787_vm1, %v743_v31 }
  0x7e   :  { %v759_v35 = vpack.c.bf16 %v727_v34, %v726_v33 }
  0x80   :  { %2019 = vmatmul.mubr.msk.bf16.gmra.mxu1 %vm787_vm1, %v759_v35 }
  0xd2   :  { %v1960_v37 = vpop.f32.mrf.mxu0 }
  0xd3   :  { %v931_v38 = vadd.f32 %v1960_v37, %v2496_v36 }
  0xd4   :  { %v922_v39 = vpop.f32.mrf.mxu0 }
  0xd5   :  { %1179 = vst [vmem:[%s2760_s6 + $0x10] sm:$0xff] %v931_v38  ;;  %v923_v40 = vadd.f32 %v2496_v36, %v922_v39 }
  0xd6   :  { %v1961_v41 = vpop.f32.mrf.mxu0 }
  0xd7   :  { %v1992_v42 = vpop.f32.mrf.mxu1  ;;  %1177 = vst [vmem:[%s2760_s6] sm:$0xff] %v923_v40  ;;  %v934_v43 = vadd.f32 %v1961_v41, %v2496_v36 }
  0xd8   :  { %v1059_v44 = vadd.f32 %v1992_v42, %v2496_v36  ;;  %v925_v45 = vpop.f32.mrf.mxu0 }
  0xd9   :  { %v1050_v46 = vpop.f32.mrf.mxu1  ;;  %1180 = vst [vmem:[%s2760_s6 + $0x18] sm:$0xff] %v934_v43  ;;  %v926_v47 = vadd.f32 %v2496_v36, %v925_v45 }
  0xda   :  { %1211 = vst [vmem:[%s2760_s6 + $0x110] sm:$0xff] %v1059_v44  ;;  %v1051_v48 = vadd.f32 %v2496_v36, %v1050_v46 }
  0xdb   :  { %v1993_v49 = vpop.f32.mrf.mxu1  ;;  %1178 = vst [vmem:[%s2760_s6 + $0x8] sm:$0xff] %v926_v47 }
  0xdc   :  { %1209 = vst [vmem:[%s2760_s6 + $0x100] sm:$0xff] %v1051_v48  ;;  %v1062_v50 = vadd.f32 %v1993_v49, %v2496_v36 }
  0xdd   :  { %v1053_v51 = vpop.f32.mrf.mxu1 }
  0xde   :  { %1212 = vst [vmem:[%s2760_s6 + $0x118] sm:$0xff] %v1062_v50  ;;  %v1054_v52 = vadd.f32 %v2496_v36, %v1053_v51 }
  0xe0   :  { %1210 = vst [vmem:[%s2760_s6 + $0x108] sm:$0xff] %v1054_v52 }
  0xe3   :  { %v1964_v53 = vpop.f32.mrf.mxu0 }
  0xe4   :  { %v947_v54 = vadd.f32 %v1964_v53, %v2496_v36 }
  0xe5   :  { %v938_v55 = vpop.f32.mrf.mxu0 }
  0xe6   :  { %1183 = vst [vmem:[%s2760_s6 + $0x30] sm:$0xff] %v947_v54  ;;  %v939_v56 = vadd.f32 %v2496_v36, %v938_v55  ;;  %v1996_v57 = vpop.f32.mrf.mxu1 }
  0xe7   :  { %v1965_v58 = vpop.f32.mrf.mxu0  ;;  %v1075_v59 = vadd.f32 %v1996_v57, %v2496_v36 }
  0xe8   :  { %1181 = vst [vmem:[%s2760_s6 + $0x20] sm:$0xff] %v939_v56  ;;  %v950_v60 = vadd.f32 %v1965_v58, %v2496_v36  ;;  %v1066_v61 = vpop.f32.mrf.mxu1 }
  0xe9   :  { %v941_v62 = vpop.f32.mrf.mxu0  ;;  %1215 = vst [vmem:[%s2760_s6 + $0x130] sm:$0xff] %v1075_v59  ;;  %v1067_v63 = vadd.f32 %v2496_v36, %v1066_v61 }
  0xea   :  { %1184 = vst [vmem:[%s2760_s6 + $0x38] sm:$0xff] %v950_v60  ;;  %v942_v0 = vadd.f32 %v2496_v36, %v941_v62  ;;  %v1997_v1 = vpop.f32.mrf.mxu1 }
  0xeb   :  { %1213 = vst [vmem:[%s2760_s6 + $0x120] sm:$0xff] %v1067_v63  ;;  %v1078_v2 = vadd.f32 %v1997_v1, %v2496_v36 }
  0xec   :  { %1182 = vst [vmem:[%s2760_s6 + $0x28] sm:$0xff] %v942_v0  ;;  %v1069_v3 = vpop.f32.mrf.mxu1 }
  0xed   :  { %1216 = vst [vmem:[%s2760_s6 + $0x138] sm:$0xff] %v1078_v2  ;;  %v1070_v4 = vadd.f32 %v2496_v36, %v1069_v3 }
  0xef   :  { %1214 = vst [vmem:[%s2760_s6 + $0x128] sm:$0xff] %v1070_v4 }
  0xf2   :  { %v1968_v5 = vpop.f32.mrf.mxu0 }
  0xf3   :  { %v963_v6 = vadd.f32 %v1968_v5, %v2496_v36 }
  0xf4   :  { %v954_v7 = vpop.f32.mrf.mxu0 }
  0xf5   :  { %1187 = vst [vmem:[%s2760_s6 + $0x50] sm:$0xff] %v963_v6  ;;  %v955_v8 = vadd.f32 %v2496_v36, %v954_v7  ;;  %v2000_v9 = vpop.f32.mrf.mxu1 }
  0xf6   :  { %v1969_v10 = vpop.f32.mrf.mxu0  ;;  %v1091_v11 = vadd.f32 %v2000_v9, %v2496_v36 }
  0xf7   :  { %1185 = vst [vmem:[%s2760_s6 + $0x40] sm:$0xff] %v955_v8  ;;  %v966_v12 = vadd.f32 %v1969_v10, %v2496_v36  ;;  %v1082_v13 = vpop.f32.mrf.mxu1 }
  0xf8   :  { %v957_v14 = vpop.f32.mrf.mxu0  ;;  %1219 = vst [vmem:[%s2760_s6 + $0x150] sm:$0xff] %v1091_v11  ;;  %v1083_v15 = vadd.f32 %v2496_v36, %v1082_v13 }
  0xf9   :  { %1188 = vst [vmem:[%s2760_s6 + $0x58] sm:$0xff] %v966_v12  ;;  %v958_v16 = vadd.f32 %v2496_v36, %v957_v14  ;;  %v2001_v17 = vpop.f32.mrf.mxu1 }
  0xfa   :  { %1217 = vst [vmem:[%s2760_s6 + $0x140] sm:$0xff] %v1083_v15  ;;  %v1094_v18 = vadd.f32 %v2001_v17, %v2496_v36 }
  0xfb   :  { %1186 = vst [vmem:[%s2760_s6 + $0x48] sm:$0xff] %v958_v16  ;;  %v1085_v19 = vpop.f32.mrf.mxu1 }
  0xfc   :  { %1220 = vst [vmem:[%s2760_s6 + $0x158] sm:$0xff] %v1094_v18  ;;  %v1086_v20 = vadd.f32 %v2496_v36, %v1085_v19 }
  0xfe   :  { %1218 = vst [vmem:[%s2760_s6 + $0x148] sm:$0xff] %v1086_v20 }
 0x101   :  { %v1972_v21 = vpop.f32.mrf.mxu0 }
 0x102   :  { %v979_v22 = vadd.f32 %v1972_v21, %v2496_v36 }
 0x103   :  { %v970_v23 = vpop.f32.mrf.mxu0 }
 0x104   :  { %1191 = vst [vmem:[%s2760_s6 + $0x70] sm:$0xff] %v979_v22  ;;  %v971_v24 = vadd.f32 %v2496_v36, %v970_v23  ;;  %v2004_v25 = vpop.f32.mrf.mxu1 }
 0x105   :  { %v1973_v26 = vpop.f32.mrf.mxu0  ;;  %v1107_v27 = vadd.f32 %v2004_v25, %v2496_v36 }
 0x106   :  { %1189 = vst [vmem:[%s2760_s6 + $0x60] sm:$0xff] %v971_v24  ;;  %v982_v28 = vadd.f32 %v1973_v26, %v2496_v36  ;;  %v1098_v29 = vpop.f32.mrf.mxu1 }
 0x107   :  { %v973_v30 = vpop.f32.mrf.mxu0  ;;  %1223 = vst [vmem:[%s2760_s6 + $0x170] sm:$0xff] %v1107_v27  ;;  %v1099_v31 = vadd.f32 %v2496_v36, %v1098_v29 }
 0x108   :  { %1192 = vst [vmem:[%s2760_s6 + $0x78] sm:$0xff] %v982_v28  ;;  %v974_v32 = vadd.f32 %v2496_v36, %v973_v30  ;;  %v2005_v33 = vpop.f32.mrf.mxu1 }
 0x109   :  { %1221 = vst [vmem:[%s2760_s6 + $0x160] sm:$0xff] %v1099_v31  ;;  %v1110_v34 = vadd.f32 %v2005_v33, %v2496_v36 }
 0x10a   :  { %1190 = vst [vmem:[%s2760_s6 + $0x68] sm:$0xff] %v974_v32  ;;  %v1101_v35 = vpop.f32.mrf.mxu1 }
 0x10b   :  { %1224 = vst [vmem:[%s2760_s6 + $0x178] sm:$0xff] %v1110_v34  ;;  %v1102_v37 = vadd.f32 %v2496_v36, %v1101_v35 }
 0x10d   :  { %1222 = vst [vmem:[%s2760_s6 + $0x168] sm:$0xff] %v1102_v37 }
 0x110   :  { %v1976_v38 = vpop.f32.mrf.mxu0 }
 0x111   :  { %v995_v39 = vadd.f32 %v1976_v38, %v2496_v36 }
 0x112   :  { %v986_v40 = vpop.f32.mrf.mxu0 }
 0x113   :  { %1195 = vst [vmem:[%s2760_s6 + $0x90] sm:$0xff] %v995_v39  ;;  %v987_v41 = vadd.f32 %v2496_v36, %v986_v40  ;;  %v2008_v42 = vpop.f32.mrf.mxu1 }
 0x114   :  { %v1977_v43 = vpop.f32.mrf.mxu0  ;;  %v1123_v44 = vadd.f32 %v2008_v42, %v2496_v36 }
 0x115   :  { %1193 = vst [vmem:[%s2760_s6 + $0x80] sm:$0xff] %v987_v41  ;;  %v998_v45 = vadd.f32 %v1977_v43, %v2496_v36  ;;  %v1114_v46 = vpop.f32.mrf.mxu1 }
 0x116   :  { %v989_v47 = vpop.f32.mrf.mxu0  ;;  %1227 = vst [vmem:[%s2760_s6 + $0x190] sm:$0xff] %v1123_v44  ;;  %v1115_v48 = vadd.f32 %v2496_v36, %v1114_v46 }
 0x117   :  { %1196 = vst [vmem:[%s2760_s6 + $0x98] sm:$0xff] %v998_v45  ;;  %v990_v49 = vadd.f32 %v2496_v36, %v989_v47  ;;  %v2009_v50 = vpop.f32.mrf.mxu1 }
 0x118   :  { %1225 = vst [vmem:[%s2760_s6 + $0x180] sm:$0xff] %v1115_v48  ;;  %v1126_v51 = vadd.f32 %v2009_v50, %v2496_v36 }
 0x119   :  { %1194 = vst [vmem:[%s2760_s6 + $0x88] sm:$0xff] %v990_v49  ;;  %v1117_v52 = vpop.f32.mrf.mxu1 }
 0x11a   :  { %1228 = vst [vmem:[%s2760_s6 + $0x198] sm:$0xff] %v1126_v51  ;;  %v1118_v53 = vadd.f32 %v2496_v36, %v1117_v52 }
 0x11c   :  { %1226 = vst [vmem:[%s2760_s6 + $0x188] sm:$0xff] %v1118_v53 }
 0x11f   :  { %v1980_v54 = vpop.f32.mrf.mxu0 }
 0x120   :  { %v1011_v55 = vadd.f32 %v1980_v54, %v2496_v36 }
 0x121   :  { %v1002_v56 = vpop.f32.mrf.mxu0 }
 0x122   :  { %1199 = vst [vmem:[%s2760_s6 + $0xb0] sm:$0xff] %v1011_v55  ;;  %v1003_v57 = vadd.f32 %v2496_v36, %v1002_v56  ;;  %v2012_v58 = vpop.f32.mrf.mxu1 }
 0x123   :  { %v1981_v59 = vpop.f32.mrf.mxu0  ;;  %v1139_v60 = vadd.f32 %v2012_v58, %v2496_v36 }
 0x124   :  { %1197 = vst [vmem:[%s2760_s6 + $0xa0] sm:$0xff] %v1003_v57  ;;  %v1014_v61 = vadd.f32 %v1981_v59, %v2496_v36  ;;  %v1130_v62 = vpop.f32.mrf.mxu1 }
 0x125   :  { %v1005_v63 = vpop.f32.mrf.mxu0  ;;  %1231 = vst [vmem:[%s2760_s6 + $0x1b0] sm:$0xff] %v1139_v60  ;;  %v1131_v0 = vadd.f32 %v2496_v36, %v1130_v62 }
 0x126   :  { %1200 = vst [vmem:[%s2760_s6 + $0xb8] sm:$0xff] %v1014_v61  ;;  %v1006_v1 = vadd.f32 %v2496_v36, %v1005_v63  ;;  %v2013_v2 = vpop.f32.mrf.mxu1 }
 0x127   :  { %1229 = vst [vmem:[%s2760_s6 + $0x1a0] sm:$0xff] %v1131_v0  ;;  %v1142_v3 = vadd.f32 %v2013_v2, %v2496_v36 }
 0x128   :  { %1198 = vst [vmem:[%s2760_s6 + $0xa8] sm:$0xff] %v1006_v1  ;;  %v1133_v4 = vpop.f32.mrf.mxu1 }
 0x129   :  { %1232 = vst [vmem:[%s2760_s6 + $0x1b8] sm:$0xff] %v1142_v3  ;;  %v1134_v5 = vadd.f32 %v2496_v36, %v1133_v4 }
 0x12b   :  { %1230 = vst [vmem:[%s2760_s6 + $0x1a8] sm:$0xff] %v1134_v5 }
 0x12e   :  { %v1984_v6 = vpop.f32.mrf.mxu0 }
 0x12f   :  { %v1027_v7 = vadd.f32 %v1984_v6, %v2496_v36 }
 0x130   :  { %v1018_v8 = vpop.f32.mrf.mxu0 }
 0x131   :  { %1203 = vst [vmem:[%s2760_s6 + $0xd0] sm:$0xff] %v1027_v7  ;;  %v1019_v9 = vadd.f32 %v2496_v36, %v1018_v8  ;;  %v2016_v10 = vpop.f32.mrf.mxu1 }
 0x132   :  { %v1985_v11 = vpop.f32.mrf.mxu0  ;;  %v1155_v12 = vadd.f32 %v2016_v10, %v2496_v36 }
 0x133   :  { %1201 = vst [vmem:[%s2760_s6 + $0xc0] sm:$0xff] %v1019_v9  ;;  %v1030_v13 = vadd.f32 %v1985_v11, %v2496_v36  ;;  %v1146_v14 = vpop.f32.mrf.mxu1 }
 0x134   :  { %v1021_v15 = vpop.f32.mrf.mxu0  ;;  %1235 = vst [vmem:[%s2760_s6 + $0x1d0] sm:$0xff] %v1155_v12  ;;  %v1147_v16 = vadd.f32 %v2496_v36, %v1146_v14 }
 0x135   :  { %1204 = vst [vmem:[%s2760_s6 + $0xd8] sm:$0xff] %v1030_v13  ;;  %v1022_v17 = vadd.f32 %v2496_v36, %v1021_v15  ;;  %v2017_v18 = vpop.f32.mrf.mxu1 }
 0x136   :  { %1233 = vst [vmem:[%s2760_s6 + $0x1c0] sm:$0xff] %v1147_v16  ;;  %v1158_v19 = vadd.f32 %v2017_v18, %v2496_v36 }
 0x137   :  { %1202 = vst [vmem:[%s2760_s6 + $0xc8] sm:$0xff] %v1022_v17  ;;  %v1149_v20 = vpop.f32.mrf.mxu1 }
 0x138   :  { %1236 = vst [vmem:[%s2760_s6 + $0x1d8] sm:$0xff] %v1158_v19  ;;  %v1150_v21 = vadd.f32 %v2496_v36, %v1149_v20 }
 0x13a   :  { %1234 = vst [vmem:[%s2760_s6 + $0x1c8] sm:$0xff] %v1150_v21 }
 0x13d   :  { %v1988_v22 = vpop.f32.mrf.mxu0 }
 0x13e   :  { %v1043_v23 = vadd.f32 %v1988_v22, %v2496_v36 }
 0x13f   :  { %v1034_v24 = vpop.f32.mrf.mxu0 }
 0x140   :  { %1207 = vst [vmem:[%s2760_s6 + $0xf0] sm:$0xff] %v1043_v23  ;;  %v1035_v25 = vadd.f32 %v2496_v36, %v1034_v24  ;;  %v2020_v26 = vpop.f32.mrf.mxu1 }
 0x141   :  { %v1989_v27 = vpop.f32.mrf.mxu0  ;;  %v1171_v28 = vadd.f32 %v2020_v26, %v2496_v36 }
 0x142   :  { %1205 = vst [vmem:[%s2760_s6 + $0xe0] sm:$0xff] %v1035_v25  ;;  %v1046_v29 = vadd.f32 %v1989_v27, %v2496_v36  ;;  %v1162_v30 = vpop.f32.mrf.mxu1 }
 0x143   :  { %v1037_v31 = vpop.f32.mrf.mxu0  ;;  %1239 = vst [vmem:[%s2760_s6 + $0x1f0] sm:$0xff] %v1171_v28  ;;  %v1163_v32 = vadd.f32 %v2496_v36, %v1162_v30 }
 0x144   :  { %1208 = vst [vmem:[%s2760_s6 + $0xf8] sm:$0xff] %v1046_v29  ;;  %v1038_v33 = vadd.f32 %v2496_v36, %v1037_v31  ;;  %v2021_v34 = vpop.f32.mrf.mxu1 }
 0x145   :  { %1237 = vst [vmem:[%s2760_s6 + $0x1e0] sm:$0xff] %v1163_v32  ;;  %v1174_v35 = vadd.f32 %v2021_v34, %v2496_v36 }
 0x146   :  { %1206 = vst [vmem:[%s2760_s6 + $0xe8] sm:$0xff] %v1038_v33  ;;  %v1165_v37 = vpop.f32.mrf.mxu1 }
 0x147   :  { %1240 = vst [vmem:[%s2760_s6 + $0x1f8] sm:$0xff] %v1174_v35  ;;  %v1166_v38 = vadd.f32 %v2496_v36, %v1165_v37 }
 0x149   :  { %1238 = vst [vmem:[%s2760_s6 + $0x1e8] sm:$0xff] %v1166_v38 }

</bundles_post_ra>
